<compile_context>
chip_gen: v7x
topology: tpu7x:2x2x1
jax: 0.10.0
libtpu: 0.0.40
codegen_flags: <defaults>
</compile_context>

<pallas_src>
import jax
import jax.numpy as jnp
from jax import lax
from jax.experimental import pallas as pl
from jax.experimental.pallas import tpu as pltpu

D_MODEL = 32
D_K = 8
D_V = 8
H = 4
D_FF = 64
EPS = 1e-5          # torch.nn.LayerNorm default eps
NEG_INF = -1e9      # stand-in for masked_fill(-inf)


# --------------------------------------------------------------------------
# Fused decoder-layer kernel (single program, whole batch in VMEM)
# --------------------------------------------------------------------------
def _decoder_layer_kernel(
        x_ref, enc_ref, mself_ref, menc_ref, pad_ref,
        wqkv_s_ref, bqkv_s_ref, wo_s_ref, bo_s_ref,
        wq_e_ref, bq_e_ref, wkv_e_ref, bkv_e_ref, wo_e_ref, bo_e_ref,
        ln1_g_ref, ln1_b_ref, ln2_g_ref, ln2_b_ref,
        w1_ref, b1_ref, w2_ref, b2_ref, ln3_g_ref, ln3_b_ref,
        out_ref, att_ref):
    B, N, D = x_ref.shape
    NE = enc_ref.shape[1]

    # Fold batch into rows (leading-dim merge only: no lane relayout).
    x = x_ref[...].reshape(B * N, D)          # (16, 32)
    enc = enc_ref[...].reshape(B * NE, D)     # (32, 32)
    pad = pad_ref[...].reshape(B * N, 1)      # (16, 1)
    scale = 1.0 / jnp.sqrt(jnp.float32(D_K))

    def split_heads(t, n, d_head):
        # (B*n, H*d_head) lane-grouped heads -> (H*B, n, d_head), z ordered (head, batch).
        return jnp.concatenate(
            [t[:, h * d_head:(h + 1) * d_head].reshape(B, n, d_head) for h in range(H)],
            axis=0)

    def merge_heads(t, n, d_head):
        # (H*B, n, d_head) -> (B*n, H*d_head); columns ordered (head, d_head).
        t = t.reshape(H, B * n, d_head)
        return jnp.concatenate([t[h] for h in range(H)], axis=-1)

    def attention(q_z, k_z, v_z, add_mask, nq, nk):
        # q_z/k_z/v_z: (H*B, n, d); add_mask: (B, nq, nk) additive.
        scores = jnp.einsum('zqd,zkd->zqk', q_z, k_z,
                            preferred_element_type=jnp.float32) * scale
        s = (scores.reshape(H, B, nq, nk) + add_mask[None]).reshape(H * B, nq, nk)
        m = jnp.max(s, axis=-1, keepdims=True)
        e = jnp.exp(s - m)
        inv = pl.reciprocal(jnp.sum(e, axis=-1, keepdims=True), approx=True)
        att_z = e * inv                                            # (H*B, nq, nk)
        ctx = jnp.einsum('zqk,zkd->zqd', att_z, v_z,
                         preferred_element_type=jnp.float32)       # (H*B, nq, d_v)
        return merge_heads(ctx, nq, D_V), att_z

    def add_ln_mask(res, y, gamma, beta):
        z = res + y
        mu = jnp.mean(z, axis=-1, keepdims=True)
        zc = z - mu
        var = jnp.mean(zc * zc, axis=-1, keepdims=True)
        return (zc * lax.rsqrt(var + EPS) * gamma + beta) * pad

    # ---- self attention: one wide QKV projection, att weights discarded ----
    qkv = jnp.dot(x, wqkv_s_ref[...], preferred_element_type=jnp.float32) + bqkv_s_ref[...]
    q_s = split_heads(qkv[:, :H * D_K], N, D_K)
    k_s = split_heads(qkv[:, H * D_K:2 * H * D_K], N, D_K)
    v_s = split_heads(qkv[:, 2 * H * D_K:], N, D_V)
    ctx_s, _ = attention(q_s, k_s, v_s, mself_ref[...], N, N)
    sa = jnp.dot(ctx_s, wo_s_ref[...], preferred_element_type=jnp.float32) + bo_s_ref[...]
    x1 = add_ln_mask(x, sa, ln1_g_ref[...], ln1_b_ref[...])

    # ---- cross attention: Q from x1, K/V from encoder output ----
    q_proj = jnp.dot(x1, wq_e_ref[...], preferred_element_type=jnp.float32) + bq_e_ref[...]
    kv = jnp.dot(enc, wkv_e_ref[...], preferred_element_type=jnp.float32) + bkv_e_ref[...]
    q_e = split_heads(q_proj, N, D_K)
    k_e = split_heads(kv[:, :H * D_K], NE, D_K)
    v_e = split_heads(kv[:, H * D_K:], NE, D_V)
    ctx_e, att_z = attention(q_e, k_e, v_e, menc_ref[...], N, NE)
    ea = jnp.dot(ctx_e, wo_e_ref[...], preferred_element_type=jnp.float32) + bo_e_ref[...]
    x2 = add_ln_mask(x1, ea, ln2_g_ref[...], ln2_b_ref[...])

    # Lane-dense cross-attention weights writeback: (B, N, H*NE).
    att_hb = att_z.reshape(H, B * N, NE)
    att_flat = jnp.concatenate([att_hb[h] for h in range(H)], axis=-1)   # (B*N, H*NE)
    att_ref[...] = att_flat.reshape(B, N, H * NE)

    # ---- position-wise FFN + residual + LN + pad mask ----
    hidden = jnp.maximum(
        jnp.dot(x2, w1_ref[...], preferred_element_type=jnp.float32) + b1_ref[...], 0.0)
    ff = jnp.dot(hidden, w2_ref[...], preferred_element_type=jnp.float32) + b2_ref[...]
    out_ref[...] = add_ln_mask(x2, ff, ln3_g_ref[...], ln3_b_ref[...]).reshape(B, N, D)


# --------------------------------------------------------------------------
# Host-side weight restructuring (done ONCE at parameter-load time, not per call)
# --------------------------------------------------------------------------
def prepare_weights(params):
    wq, bq, wk, bk, wv, bv, wo, bo = params['self_att']
    wqkv_s = jnp.concatenate([wq, wk, wv], axis=1)     # (D, 3*H*D_K) = (32, 96)
    bqkv_s = jnp.concatenate([bq, bk, bv], axis=1)     # (1, 96)
    wq2, bq2, wk2, bk2, wv2, bv2, wo2, bo2 = params['enc_att']
    wkv_e = jnp.concatenate([wk2, wv2], axis=1)        # (D, 2*H*D_K) = (32, 64)
    bkv_e = jnp.concatenate([bk2, bv2], axis=1)        # (1, 64)
    w1, b1, w2, b2, ln3_g, ln3_b = params['pwff']
    return (wqkv_s, bqkv_s, wo, bo,
            wq2, bq2, wkv_e, bkv_e, wo2, bo2,
            params['ln1_g'], params['ln1_b'], params['ln2_g'], params['ln2_b'],
            w1, b1, w2, b2, ln3_g, ln3_b)


# --------------------------------------------------------------------------
# DecoderLayer forward: one fused pallas_call, no grid (single program)
# --------------------------------------------------------------------------
def decoder_layer(weights, x, enc_out, mask_pad, add_self, add_enc):
    B, N, D = x.shape
    NE = enc_out.shape[1]
    n_in = 5 + len(weights)

    out, att_lane = pl.pallas_call(
        _decoder_layer_kernel,
        out_shape=(jax.ShapeDtypeStruct((B, N, D), jnp.float32),
                   jax.ShapeDtypeStruct((B, N, H * NE), jnp.float32)),
        in_specs=[pl.BlockSpec(memory_space=pltpu.MemorySpace.VMEM)] * n_in,
        out_specs=(pl.BlockSpec(memory_space=pltpu.MemorySpace.VMEM),
                   pl.BlockSpec(memory_space=pltpu.MemorySpace.VMEM)),
    )(x, enc_out, add_self, add_enc, mask_pad, *weights)

    # Un-flatten the lane-dense attention output back to (B, H, N, NE) (cheap XLA plumbing).
    att = att_lane.reshape(B, N, H, NE).transpose(0, 2, 1, 3)
    return out, att


# Pure-JAX reference for verification --------------------------------------
def decoder_ref(params, x, enc_out, mask_pad, add_self, add_enc):
    def mha_ref(q, kv, add_mask, p):
        wq, bq, wk, bk, wv, bv, wo, bo = p
        B, Nq, _ = q.shape
        Nk = kv.shape[1]
        qp = (q @ wq + bq).reshape(B, Nq, H, D_K).transpose(0, 2, 1, 3)
        kp = (kv @ wk + bk).reshape(B, Nk, H, D_K).transpose(0, 2, 1, 3)
        vp = (kv @ wv + bv).reshape(B, Nk, H, D_V).transpose(0, 2, 1, 3)
        sc = jnp.einsum('bhqd,bhkd->bhqk', qp, kp) / jnp.sqrt(jnp.float32(D_K))
        sc = sc + add_mask[:, None]
        att = jax.nn.softmax(sc, axis=-1)
        o = jnp.einsum('bhqk,bhkd->bhqd', att, vp).transpose(0, 2, 1, 3)
        return o.reshape(B, Nq, H * D_V) @ wo + bo, att

    def ln(z, g, b):
        mu = z.mean(-1, keepdims=True)
        var = ((z - mu) ** 2).mean(-1, keepdims=True)
        return (z - mu) / jnp.sqrt(var + EPS) * g + b

    sa, _ = mha_ref(x, x, add_self, params['self_att'])
    x1 = ln(x + sa, params['ln1_g'], params['ln1_b']) * mask_pad
    ea, att = mha_ref(x1, enc_out, add_enc, params['enc_att'])
    x2 = ln(x1 + ea, params['ln2_g'], params['ln2_b']) * mask_pad
    w1, b1, w2, b2, gf, bf = params['pwff']
    ff_inner = jnp.maximum(x2 @ w1 + b1, 0.0) @ w2 + b2
    ff = ln(x2 + ff_inner, gf, bf) * mask_pad
    return ff, att


# --------------------------------------------------------------------------
def init_mha_params(key, scale=0.05):
    ks = jax.random.split(key, 8)
    wq = jax.random.normal(ks[0], (D_MODEL, H * D_K), jnp.float32) * scale
    bq = jax.random.normal(ks[1], (1, H * D_K), jnp.float32) * scale
    wk = jax.random.normal(ks[2], (D_MODEL, H * D_K), jnp.float32) * scale
    bk = jax.random.normal(ks[3], (1, H * D_K), jnp.float32) * scale
    wv = jax.random.normal(ks[4], (D_MODEL, H * D_V), jnp.float32) * scale
    bv = jax.random.normal(ks[5], (1, H * D_V), jnp.float32) * scale
    wo = jax.random.normal(ks[6], (H * D_V, D_MODEL), jnp.float32) * scale
    bo = jax.random.normal(ks[7], (1, D_MODEL), jnp.float32) * scale
    return (wq, bq, wk, bk, wv, bv, wo, bo)


if __name__ == "__main__":
    key = jax.random.PRNGKey(0)
    B, N, NE = 2, 8, 16   # batch, decoder seq len, encoder seq len

    k_in, k_enc, k_sa, k_ea, k_ff = jax.random.split(key, 5)

    params = {
        'self_att': init_mha_params(k_sa),
        'enc_att': init_mha_params(k_ea),
        'ln1_g': jnp.ones((1, D_MODEL), jnp.float32),
        'ln1_b': jnp.zeros((1, D_MODEL), jnp.float32),
        'ln2_g': jnp.ones((1, D_MODEL), jnp.float32),
        'ln2_b': jnp.zeros((1, D_MODEL), jnp.float32),
    }
    kf = jax.random.split(k_ff, 4)
    params['pwff'] = (
        jax.random.normal(kf[0], (D_MODEL, D_FF), jnp.float32) * 0.05,
        jax.random.normal(kf[1], (1, D_FF), jnp.float32) * 0.05,
        jax.random.normal(kf[2], (D_FF, D_MODEL), jnp.float32) * 0.05,
        jax.random.normal(kf[3], (1, D_MODEL), jnp.float32) * 0.05,
        jnp.ones((1, D_MODEL), jnp.float32),
        jnp.zeros((1, D_MODEL), jnp.float32),
    )

    x = jax.random.normal(k_in, (B, N, D_MODEL), jnp.float32)
    enc_out = jax.random.normal(k_enc, (B, NE, D_MODEL), jnp.float32)

    # masks (boolean semantics of the torch module, converted to additive / float)
    causal = jnp.triu(jnp.ones((N, N), bool), k=1)                       # True = masked
    add_self = jnp.where(jnp.broadcast_to(causal, (B, N, N)), NEG_INF, 0.0).astype(jnp.float32)

    enc_valid = jnp.arange(NE)[None, :] < jnp.array([NE, NE - 3])[:, None]   # (B, NE)
    add_enc = jnp.where(enc_valid[:, None, :], 0.0, NEG_INF).astype(jnp.float32)
    add_enc = jnp.broadcast_to(add_enc, (B, N, NE))

    pad_valid = jnp.arange(N)[None, :] < jnp.array([N, N - 2])[:, None]      # (B, N)
    mask_pad = pad_valid[:, :, None].astype(jnp.float32)                     # (B, N, 1)

    # Weight restructuring hoisted out of the forward path (done once).
    weights = prepare_weights(params)

    run = jax.jit(decoder_layer)
    ff, att = run(weights, x, enc_out, mask_pad, add_self, add_enc)
    jax.block_until_ready((ff, att))

    ff_ref, att_ref = decoder_ref(params, x, enc_out, mask_pad, add_self, add_enc)
    assert ff.shape == (B, N, D_MODEL) and att.shape == (B, H, N, NE)
    assert jnp.allclose(ff, ff_ref, atol=2e-3, rtol=2e-3), "ff mismatch vs reference"
    assert jnp.allclose(att, att_ref, atol=2e-3, rtol=2e-3), "att mismatch vs reference"

    print("KERNEL_OK")
</pallas_src>

<mosaic_0001>
module attributes {stable_mosaic.version = 11 : i64} {
  func.func @_decoder_layer_kernel(%arg0: memref<2x8x32xf32, #tpu.memory_space<vmem>>, %arg1: memref<2x16x32xf32, #tpu.memory_space<vmem>>, %arg2: memref<2x8x8xf32, #tpu.memory_space<vmem>>, %arg3: memref<2x8x16xf32, #tpu.memory_space<vmem>>, %arg4: memref<2x8x1xf32, #tpu.memory_space<vmem>>, %arg5: memref<32x96xf32, #tpu.memory_space<vmem>>, %arg6: memref<1x96xf32, #tpu.memory_space<vmem>>, %arg7: memref<32x32xf32, #tpu.memory_space<vmem>>, %arg8: memref<1x32xf32, #tpu.memory_space<vmem>>, %arg9: memref<32x32xf32, #tpu.memory_space<vmem>>, %arg10: memref<1x32xf32, #tpu.memory_space<vmem>>, %arg11: memref<32x64xf32, #tpu.memory_space<vmem>>, %arg12: memref<1x64xf32, #tpu.memory_space<vmem>>, %arg13: memref<32x32xf32, #tpu.memory_space<vmem>>, %arg14: memref<1x32xf32, #tpu.memory_space<vmem>>, %arg15: memref<1x32xf32, #tpu.memory_space<vmem>>, %arg16: memref<1x32xf32, #tpu.memory_space<vmem>>, %arg17: memref<1x32xf32, #tpu.memory_space<vmem>>, %arg18: memref<1x32xf32, #tpu.memory_space<vmem>>, %arg19: memref<32x64xf32, #tpu.memory_space<vmem>>, %arg20: memref<1x64xf32, #tpu.memory_space<vmem>>, %arg21: memref<64x32xf32, #tpu.memory_space<vmem>>, %arg22: memref<1x32xf32, #tpu.memory_space<vmem>>, %arg23: memref<1x32xf32, #tpu.memory_space<vmem>>, %arg24: memref<1x32xf32, #tpu.memory_space<vmem>>, %arg25: memref<2x8x32xf32, #tpu.memory_space<vmem>>, %arg26: memref<2x8x64xf32, #tpu.memory_space<vmem>>) attributes {dimension_semantics = [], scalar_prefetch = 0 : i64, scratch_operands = 0 : i64, tpu.core_type = #tpu.core_type<tc>} {
    %c0 = arith.constant 0 : index
    %c0_0 = arith.constant 0 : index
    %c0_1 = arith.constant 0 : index
    %0 = vector.load %arg0[%c0, %c0_0, %c0_1] : memref<2x8x32xf32, #tpu.memory_space<vmem>>, vector<2x8x32xf32>
    %1 = vector.shape_cast %0 : vector<2x8x32xf32> to vector<16x32xf32>
    %c0_2 = arith.constant 0 : index
    %c0_3 = arith.constant 0 : index
    %c0_4 = arith.constant 0 : index
    %2 = vector.load %arg1[%c0_2, %c0_3, %c0_4] : memref<2x16x32xf32, #tpu.memory_space<vmem>>, vector<2x16x32xf32>
    %3 = vector.shape_cast %2 : vector<2x16x32xf32> to vector<32x32xf32>
    %c0_5 = arith.constant 0 : index
    %c0_6 = arith.constant 0 : index
    %c0_7 = arith.constant 0 : index
    %4 = vector.load %arg4[%c0_5, %c0_6, %c0_7] : memref<2x8x1xf32, #tpu.memory_space<vmem>>, vector<2x8x1xf32>
    %5 = vector.shape_cast %4 : vector<2x8x1xf32> to vector<16x1xf32>
    %cst = arith.constant 8.000000e+00 : f32
    %6 = math.sqrt %cst : f32
    %cst_8 = arith.constant 1.000000e+00 : f32
    %7 = arith.divf %cst_8, %6 : f32
    %c0_9 = arith.constant 0 : index
    %c0_10 = arith.constant 0 : index
    %8 = vector.load %arg5[%c0_9, %c0_10] : memref<32x96xf32, #tpu.memory_space<vmem>>, vector<32x96xf32>
    %cst_11 = arith.constant dense<0.000000e+00> : vector<16x96xf32>
    %9 = tpu.matmul %1, %8, %cst_11 {dimension_numbers = #tpu.dot_dimension_numbers<[1], [0], [0], [1], [0, 0, 1, 1], [], []>} : vector<16x32xf32>, vector<32x96xf32>, vector<16x96xf32> -> vector<16x96xf32>
    %c0_12 = arith.constant 0 : index
    %c0_13 = arith.constant 0 : index
    %10 = vector.load %arg6[%c0_12, %c0_13] : memref<1x96xf32, #tpu.memory_space<vmem>>, vector<1x96xf32>
    %11 = vector.broadcast %10 : vector<1x96xf32> to vector<16x96xf32>
    %12 = arith.addf %9, %11 : vector<16x96xf32>
    %13 = vector.extract_strided_slice %12 {offsets = [0, 0], sizes = [16, 32], strides = [1, 1]} : vector<16x96xf32> to vector<16x32xf32>
    %14 = vector.extract_strided_slice %13 {offsets = [0, 0], sizes = [16, 8], strides = [1, 1]} : vector<16x32xf32> to vector<16x8xf32>
    %15 = vector.shape_cast %14 : vector<16x8xf32> to vector<2x8x8xf32>
    %16 = vector.extract_strided_slice %13 {offsets = [0, 8], sizes = [16, 8], strides = [1, 1]} : vector<16x32xf32> to vector<16x8xf32>
    %17 = vector.shape_cast %16 : vector<16x8xf32> to vector<2x8x8xf32>
    %18 = vector.extract_strided_slice %13 {offsets = [0, 16], sizes = [16, 8], strides = [1, 1]} : vector<16x32xf32> to vector<16x8xf32>
    %19 = vector.shape_cast %18 : vector<16x8xf32> to vector<2x8x8xf32>
    %20 = vector.extract_strided_slice %13 {offsets = [0, 24], sizes = [16, 8], strides = [1, 1]} : vector<16x32xf32> to vector<16x8xf32>
    %21 = vector.shape_cast %20 : vector<16x8xf32> to vector<2x8x8xf32>
    %22 = tpu.concatenate %15, %17, %19, %21 in 0 : vector<2x8x8xf32>, vector<2x8x8xf32>, vector<2x8x8xf32>, vector<2x8x8xf32> -> vector<8x8x8xf32>
    %23 = vector.extract_strided_slice %12 {offsets = [0, 32], sizes = [16, 32], strides = [1, 1]} : vector<16x96xf32> to vector<16x32xf32>
    %24 = vector.extract_strided_slice %23 {offsets = [0, 0], sizes = [16, 8], strides = [1, 1]} : vector<16x32xf32> to vector<16x8xf32>
    %25 = vector.shape_cast %24 : vector<16x8xf32> to vector<2x8x8xf32>
    %26 = vector.extract_strided_slice %23 {offsets = [0, 8], sizes = [16, 8], strides = [1, 1]} : vector<16x32xf32> to vector<16x8xf32>
    %27 = vector.shape_cast %26 : vector<16x8xf32> to vector<2x8x8xf32>
    %28 = vector.extract_strided_slice %23 {offsets = [0, 16], sizes = [16, 8], strides = [1, 1]} : vector<16x32xf32> to vector<16x8xf32>
    %29 = vector.shape_cast %28 : vector<16x8xf32> to vector<2x8x8xf32>
    %30 = vector.extract_strided_slice %23 {offsets = [0, 24], sizes = [16, 8], strides = [1, 1]} : vector<16x32xf32> to vector<16x8xf32>
    %31 = vector.shape_cast %30 : vector<16x8xf32> to vector<2x8x8xf32>
    %32 = tpu.concatenate %25, %27, %29, %31 in 0 : vector<2x8x8xf32>, vector<2x8x8xf32>, vector<2x8x8xf32>, vector<2x8x8xf32> -> vector<8x8x8xf32>
    %33 = vector.extract_strided_slice %12 {offsets = [0, 64], sizes = [16, 32], strides = [1, 1]} : vector<16x96xf32> to vector<16x32xf32>
    %34 = vector.extract_strided_slice %33 {offsets = [0, 0], sizes = [16, 8], strides = [1, 1]} : vector<16x32xf32> to vector<16x8xf32>
    %35 = vector.shape_cast %34 : vector<16x8xf32> to vector<2x8x8xf32>
    %36 = vector.extract_strided_slice %33 {offsets = [0, 8], sizes = [16, 8], strides = [1, 1]} : vector<16x32xf32> to vector<16x8xf32>
    %37 = vector.shape_cast %36 : vector<16x8xf32> to vector<2x8x8xf32>
    %38 = vector.extract_strided_slice %33 {offsets = [0, 16], sizes = [16, 8], strides = [1, 1]} : vector<16x32xf32> to vector<16x8xf32>
    %39 = vector.shape_cast %38 : vector<16x8xf32> to vector<2x8x8xf32>
    %40 = vector.extract_strided_slice %33 {offsets = [0, 24], sizes = [16, 8], strides = [1, 1]} : vector<16x32xf32> to vector<16x8xf32>
    %41 = vector.shape_cast %40 : vector<16x8xf32> to vector<2x8x8xf32>
    %42 = tpu.concatenate %35, %37, %39, %41 in 0 : vector<2x8x8xf32>, vector<2x8x8xf32>, vector<2x8x8xf32>, vector<2x8x8xf32> -> vector<8x8x8xf32>
    %c0_14 = arith.constant 0 : index
    %c0_15 = arith.constant 0 : index
    %c0_16 = arith.constant 0 : index
    %43 = vector.load %arg2[%c0_14, %c0_15, %c0_16] : memref<2x8x8xf32, #tpu.memory_space<vmem>>, vector<2x8x8xf32>
    "tpu.trace_start"() <{level = 10 : i32, message = "zqd,zkd->zqk"}> : () -> ()
    %cst_17 = arith.constant dense<0.000000e+00> : vector<8x8x8xf32>
    %44 = tpu.matmul %22, %32, %cst_17 {dimension_numbers = #tpu.dot_dimension_numbers<[2], [2], [1], [1], [0, 0, 0, 1, 1, 1], [0], [0]>} : vector<8x8x8xf32>, vector<8x8x8xf32>, vector<8x8x8xf32> -> vector<8x8x8xf32>
    "tpu.trace_stop"() : () -> ()
    %45 = vector.broadcast %7 : f32 to vector<8x8x8xf32>
    %46 = arith.mulf %44, %45 : vector<8x8x8xf32>
    %47 = vector.shape_cast %46 : vector<8x8x8xf32> to vector<4x2x8x8xf32>
    %48 = vector.shape_cast %43 : vector<2x8x8xf32> to vector<1x2x8x8xf32>
    %49 = vector.broadcast %48 : vector<1x2x8x8xf32> to vector<4x2x8x8xf32>
    %50 = arith.addf %47, %49 : vector<4x2x8x8xf32>
    %51 = vector.shape_cast %50 : vector<4x2x8x8xf32> to vector<8x8x8xf32>
    %cst_18 = arith.constant dense<0xFF800000> : vector<8x8xf32>
    %52 = vector.multi_reduction <maximumf>, %51, %cst_18 [2] : vector<8x8x8xf32> to vector<8x8xf32>
    %53 = vector.shape_cast %52 : vector<8x8xf32> to vector<8x8x1xf32>
    %54 = vector.broadcast %53 : vector<8x8x1xf32> to vector<8x8x8xf32>
    %55 = arith.subf %51, %54 : vector<8x8x8xf32>
    %56 = math.exp %55 : vector<8x8x8xf32>
    %cst_19 = arith.constant dense<0.000000e+00> : vector<8x8xf32>
    %57 = vector.multi_reduction <add>, %56, %cst_19 [2] : vector<8x8x8xf32> to vector<8x8xf32>
    %58 = vector.shape_cast %57 : vector<8x8xf32> to vector<8x8x1xf32>
    %59 = tpu.reciprocal %58 {approx = true} : vector<8x8x1xf32> -> vector<8x8x1xf32>
    %60 = vector.broadcast %59 : vector<8x8x1xf32> to vector<8x8x8xf32>
    %61 = arith.mulf %56, %60 : vector<8x8x8xf32>
    "tpu.trace_start"() <{level = 10 : i32, message = "zqk,zkd->zqd"}> : () -> ()
    %cst_20 = arith.constant dense<0.000000e+00> : vector<8x8x8xf32>
    %62 = tpu.matmul %61, %42, %cst_20 {dimension_numbers = #tpu.dot_dimension_numbers<[2], [1], [1], [2], [0, 0, 0, 1, 1, 2], [0], [0]>} : vector<8x8x8xf32>, vector<8x8x8xf32>, vector<8x8x8xf32> -> vector<8x8x8xf32>
    "tpu.trace_stop"() : () -> ()
    %63 = vector.shape_cast %62 : vector<8x8x8xf32> to vector<4x16x8xf32>
    %64 = vector.extract_strided_slice %63 {offsets = [0, 0, 0], sizes = [1, 16, 8], strides = [1, 1, 1]} : vector<4x16x8xf32> to vector<1x16x8xf32>
    %65 = vector.shape_cast %64 : vector<1x16x8xf32> to vector<16x8xf32>
    %66 = vector.extract_strided_slice %63 {offsets = [1, 0, 0], sizes = [1, 16, 8], strides = [1, 1, 1]} : vector<4x16x8xf32> to vector<1x16x8xf32>
    %67 = vector.shape_cast %66 : vector<1x16x8xf32> to vector<16x8xf32>
    %68 = vector.extract_strided_slice %63 {offsets = [2, 0, 0], sizes = [1, 16, 8], strides = [1, 1, 1]} : vector<4x16x8xf32> to vector<1x16x8xf32>
    %69 = vector.shape_cast %68 : vector<1x16x8xf32> to vector<16x8xf32>
    %70 = vector.extract_strided_slice %63 {offsets = [3, 0, 0], sizes = [1, 16, 8], strides = [1, 1, 1]} : vector<4x16x8xf32> to vector<1x16x8xf32>
    %71 = vector.shape_cast %70 : vector<1x16x8xf32> to vector<16x8xf32>
    %72 = tpu.concatenate %65, %67, %69, %71 in 1 : vector<16x8xf32>, vector<16x8xf32>, vector<16x8xf32>, vector<16x8xf32> -> vector<16x32xf32>
    %c0_21 = arith.constant 0 : index
    %c0_22 = arith.constant 0 : index
    %73 = vector.load %arg7[%c0_21, %c0_22] : memref<32x32xf32, #tpu.memory_space<vmem>>, vector<32x32xf32>
    %cst_23 = arith.constant dense<0.000000e+00> : vector<16x32xf32>
    %74 = tpu.matmul %72, %73, %cst_23 {dimension_numbers = #tpu.dot_dimension_numbers<[1], [0], [0], [1], [0, 0, 1, 1], [], []>} : vector<16x32xf32>, vector<32x32xf32>, vector<16x32xf32> -> vector<16x32xf32>
    %c0_24 = arith.constant 0 : index
    %c0_25 = arith.constant 0 : index
    %75 = vector.load %arg8[%c0_24, %c0_25] : memref<1x32xf32, #tpu.memory_space<vmem>>, vector<1x32xf32>
    %76 = vector.broadcast %75 : vector<1x32xf32> to vector<16x32xf32>
    %77 = arith.addf %74, %76 : vector<16x32xf32>
    %c0_26 = arith.constant 0 : index
    %c0_27 = arith.constant 0 : index
    %78 = vector.load %arg15[%c0_26, %c0_27] : memref<1x32xf32, #tpu.memory_space<vmem>>, vector<1x32xf32>
    %c0_28 = arith.constant 0 : index
    %c0_29 = arith.constant 0 : index
    %79 = vector.load %arg16[%c0_28, %c0_29] : memref<1x32xf32, #tpu.memory_space<vmem>>, vector<1x32xf32>
    %80 = arith.addf %1, %77 : vector<16x32xf32>
    %cst_30 = arith.constant dense<0.000000e+00> : vector<16xf32>
    %81 = vector.multi_reduction <add>, %80, %cst_30 [1] : vector<16x32xf32> to vector<16xf32>
    %82 = vector.shape_cast %81 : vector<16xf32> to vector<16x1xf32>
    %cst_31 = arith.constant 3.200000e+01 : f32
    %83 = vector.broadcast %cst_31 : f32 to vector<16x1xf32>
    %84 = arith.divf %82, %83 : vector<16x1xf32>
    %85 = vector.broadcast %84 : vector<16x1xf32> to vector<16x32xf32>
    %86 = arith.subf %80, %85 : vector<16x32xf32>
    %87 = arith.mulf %86, %86 : vector<16x32xf32>
    %cst_32 = arith.constant dense<0.000000e+00> : vector<16xf32>
    %88 = vector.multi_reduction <add>, %87, %cst_32 [1] : vector<16x32xf32> to vector<16xf32>
    %89 = vector.shape_cast %88 : vector<16xf32> to vector<16x1xf32>
    %cst_33 = arith.constant 3.200000e+01 : f32
    %90 = vector.broadcast %cst_33 : f32 to vector<16x1xf32>
    %91 = arith.divf %89, %90 : vector<16x1xf32>
    %cst_34 = arith.constant 9.99999974E-6 : f32
    %92 = vector.broadcast %cst_34 : f32 to vector<16x1xf32>
    %93 = arith.addf %91, %92 : vector<16x1xf32>
    %94 = math.rsqrt %93 : vector<16x1xf32>
    %95 = vector.broadcast %94 : vector<16x1xf32> to vector<16x32xf32>
    %96 = arith.mulf %86, %95 : vector<16x32xf32>
    %97 = vector.broadcast %78 : vector<1x32xf32> to vector<16x32xf32>
    %98 = arith.mulf %96, %97 : vector<16x32xf32>
    %99 = vector.broadcast %79 : vector<1x32xf32> to vector<16x32xf32>
    %100 = arith.addf %98, %99 : vector<16x32xf32>
    %101 = vector.broadcast %5 : vector<16x1xf32> to vector<16x32xf32>
    %102 = arith.mulf %100, %101 : vector<16x32xf32>
    %c0_35 = arith.constant 0 : index
    %c0_36 = arith.constant 0 : index
    %103 = vector.load %arg9[%c0_35, %c0_36] : memref<32x32xf32, #tpu.memory_space<vmem>>, vector<32x32xf32>
    %cst_37 = arith.constant dense<0.000000e+00> : vector<16x32xf32>
    %104 = tpu.matmul %102, %103, %cst_37 {dimension_numbers = #tpu.dot_dimension_numbers<[1], [0], [0], [1], [0, 0, 1, 1], [], []>} : vector<16x32xf32>, vector<32x32xf32>, vector<16x32xf32> -> vector<16x32xf32>
    %c0_38 = arith.constant 0 : index
    %c0_39 = arith.constant 0 : index
    %105 = vector.load %arg10[%c0_38, %c0_39] : memref<1x32xf32, #tpu.memory_space<vmem>>, vector<1x32xf32>
    %106 = vector.broadcast %105 : vector<1x32xf32> to vector<16x32xf32>
    %107 = arith.addf %104, %106 : vector<16x32xf32>
    %c0_40 = arith.constant 0 : index
    %c0_41 = arith.constant 0 : index
    %108 = vector.load %arg11[%c0_40, %c0_41] : memref<32x64xf32, #tpu.memory_space<vmem>>, vector<32x64xf32>
    %cst_42 = arith.constant dense<0.000000e+00> : vector<32x64xf32>
    %109 = tpu.matmul %3, %108, %cst_42 {dimension_numbers = #tpu.dot_dimension_numbers<[1], [0], [0], [1], [0, 0, 1, 1], [], []>} : vector<32x32xf32>, vector<32x64xf32>, vector<32x64xf32> -> vector<32x64xf32>
    %c0_43 = arith.constant 0 : index
    %c0_44 = arith.constant 0 : index
    %110 = vector.load %arg12[%c0_43, %c0_44] : memref<1x64xf32, #tpu.memory_space<vmem>>, vector<1x64xf32>
    %111 = vector.broadcast %110 : vector<1x64xf32> to vector<32x64xf32>
    %112 = arith.addf %109, %111 : vector<32x64xf32>
    %113 = vector.extract_strided_slice %107 {offsets = [0, 0], sizes = [16, 8], strides = [1, 1]} : vector<16x32xf32> to vector<16x8xf32>
    %114 = vector.shape_cast %113 : vector<16x8xf32> to vector<2x8x8xf32>
    %115 = vector.extract_strided_slice %107 {offsets = [0, 8], sizes = [16, 8], strides = [1, 1]} : vector<16x32xf32> to vector<16x8xf32>
    %116 = vector.shape_cast %115 : vector<16x8xf32> to vector<2x8x8xf32>
    %117 = vector.extract_strided_slice %107 {offsets = [0, 16], sizes = [16, 8], strides = [1, 1]} : vector<16x32xf32> to vector<16x8xf32>
    %118 = vector.shape_cast %117 : vector<16x8xf32> to vector<2x8x8xf32>
    %119 = vector.extract_strided_slice %107 {offsets = [0, 24], sizes = [16, 8], strides = [1, 1]} : vector<16x32xf32> to vector<16x8xf32>
    %120 = vector.shape_cast %119 : vector<16x8xf32> to vector<2x8x8xf32>
    %121 = tpu.concatenate %114, %116, %118, %120 in 0 : vector<2x8x8xf32>, vector<2x8x8xf32>, vector<2x8x8xf32>, vector<2x8x8xf32> -> vector<8x8x8xf32>
    %122 = vector.extract_strided_slice %112 {offsets = [0, 0], sizes = [32, 32], strides = [1, 1]} : vector<32x64xf32> to vector<32x32xf32>
    %123 = vector.extract_strided_slice %122 {offsets = [0, 0], sizes = [32, 8], strides = [1, 1]} : vector<32x32xf32> to vector<32x8xf32>
    %124 = vector.shape_cast %123 : vector<32x8xf32> to vector<2x16x8xf32>
    %125 = vector.extract_strided_slice %122 {offsets = [0, 8], sizes = [32, 8], strides = [1, 1]} : vector<32x32xf32> to vector<32x8xf32>
    %126 = vector.shape_cast %125 : vector<32x8xf32> to vector<2x16x8xf32>
    %127 = vector.extract_strided_slice %122 {offsets = [0, 16], sizes = [32, 8], strides = [1, 1]} : vector<32x32xf32> to vector<32x8xf32>
    %128 = vector.shape_cast %127 : vector<32x8xf32> to vector<2x16x8xf32>
    %129 = vector.extract_strided_slice %122 {offsets = [0, 24], sizes = [32, 8], strides = [1, 1]} : vector<32x32xf32> to vector<32x8xf32>
    %130 = vector.shape_cast %129 : vector<32x8xf32> to vector<2x16x8xf32>
    %131 = tpu.concatenate %124, %126, %128, %130 in 0 : vector<2x16x8xf32>, vector<2x16x8xf32>, vector<2x16x8xf32>, vector<2x16x8xf32> -> vector<8x16x8xf32>
    %132 = vector.extract_strided_slice %112 {offsets = [0, 32], sizes = [32, 32], strides = [1, 1]} : vector<32x64xf32> to vector<32x32xf32>
    %133 = vector.extract_strided_slice %132 {offsets = [0, 0], sizes = [32, 8], strides = [1, 1]} : vector<32x32xf32> to vector<32x8xf32>
    %134 = vector.shape_cast %133 : vector<32x8xf32> to vector<2x16x8xf32>
    %135 = vector.extract_strided_slice %132 {offsets = [0, 8], sizes = [32, 8], strides = [1, 1]} : vector<32x32xf32> to vector<32x8xf32>
    %136 = vector.shape_cast %135 : vector<32x8xf32> to vector<2x16x8xf32>
    %137 = vector.extract_strided_slice %132 {offsets = [0, 16], sizes = [32, 8], strides = [1, 1]} : vector<32x32xf32> to vector<32x8xf32>
    %138 = vector.shape_cast %137 : vector<32x8xf32> to vector<2x16x8xf32>
    %139 = vector.extract_strided_slice %132 {offsets = [0, 24], sizes = [32, 8], strides = [1, 1]} : vector<32x32xf32> to vector<32x8xf32>
    %140 = vector.shape_cast %139 : vector<32x8xf32> to vector<2x16x8xf32>
    %141 = tpu.concatenate %134, %136, %138, %140 in 0 : vector<2x16x8xf32>, vector<2x16x8xf32>, vector<2x16x8xf32>, vector<2x16x8xf32> -> vector<8x16x8xf32>
    %c0_45 = arith.constant 0 : index
    %c0_46 = arith.constant 0 : index
    %c0_47 = arith.constant 0 : index
    %142 = vector.load %arg3[%c0_45, %c0_46, %c0_47] : memref<2x8x16xf32, #tpu.memory_space<vmem>>, vector<2x8x16xf32>
    "tpu.trace_start"() <{level = 10 : i32, message = "zqd,zkd->zqk"}> : () -> ()
    %cst_48 = arith.constant dense<0.000000e+00> : vector<8x8x16xf32>
    %143 = tpu.matmul %121, %131, %cst_48 {dimension_numbers = #tpu.dot_dimension_numbers<[2], [2], [1], [1], [0, 0, 0, 1, 1, 1], [0], [0]>} : vector<8x8x8xf32>, vector<8x16x8xf32>, vector<8x8x16xf32> -> vector<8x8x16xf32>
    "tpu.trace_stop"() : () -> ()
    %144 = vector.broadcast %7 : f32 to vector<8x8x16xf32>
    %145 = arith.mulf %143, %144 : vector<8x8x16xf32>
    %146 = vector.shape_cast %145 : vector<8x8x16xf32> to vector<4x2x8x16xf32>
    %147 = vector.shape_cast %142 : vector<2x8x16xf32> to vector<1x2x8x16xf32>
    %148 = vector.broadcast %147 : vector<1x2x8x16xf32> to vector<4x2x8x16xf32>
    %149 = arith.addf %146, %148 : vector<4x2x8x16xf32>
    %150 = vector.shape_cast %149 : vector<4x2x8x16xf32> to vector<8x8x16xf32>
    %cst_49 = arith.constant dense<0xFF800000> : vector<8x8xf32>
    %151 = vector.multi_reduction <maximumf>, %150, %cst_49 [2] : vector<8x8x16xf32> to vector<8x8xf32>
    %152 = vector.shape_cast %151 : vector<8x8xf32> to vector<8x8x1xf32>
    %153 = vector.broadcast %152 : vector<8x8x1xf32> to vector<8x8x16xf32>
    %154 = arith.subf %150, %153 : vector<8x8x16xf32>
    %155 = math.exp %154 : vector<8x8x16xf32>
    %cst_50 = arith.constant dense<0.000000e+00> : vector<8x8xf32>
    %156 = vector.multi_reduction <add>, %155, %cst_50 [2] : vector<8x8x16xf32> to vector<8x8xf32>
    %157 = vector.shape_cast %156 : vector<8x8xf32> to vector<8x8x1xf32>
    %158 = tpu.reciprocal %157 {approx = true} : vector<8x8x1xf32> -> vector<8x8x1xf32>
    %159 = vector.broadcast %158 : vector<8x8x1xf32> to vector<8x8x16xf32>
    %160 = arith.mulf %155, %159 : vector<8x8x16xf32>
    "tpu.trace_start"() <{level = 10 : i32, message = "zqk,zkd->zqd"}> : () -> ()
    %cst_51 = arith.constant dense<0.000000e+00> : vector<8x8x8xf32>
    %161 = tpu.matmul %160, %141, %cst_51 {dimension_numbers = #tpu.dot_dimension_numbers<[2], [1], [1], [2], [0, 0, 0, 1, 1, 2], [0], [0]>} : vector<8x8x16xf32>, vector<8x16x8xf32>, vector<8x8x8xf32> -> vector<8x8x8xf32>
    "tpu.trace_stop"() : () -> ()
    %162 = vector.shape_cast %161 : vector<8x8x8xf32> to vector<4x16x8xf32>
    %163 = vector.extract_strided_slice %162 {offsets = [0, 0, 0], sizes = [1, 16, 8], strides = [1, 1, 1]} : vector<4x16x8xf32> to vector<1x16x8xf32>
    %164 = vector.shape_cast %163 : vector<1x16x8xf32> to vector<16x8xf32>
    %165 = vector.extract_strided_slice %162 {offsets = [1, 0, 0], sizes = [1, 16, 8], strides = [1, 1, 1]} : vector<4x16x8xf32> to vector<1x16x8xf32>
    %166 = vector.shape_cast %165 : vector<1x16x8xf32> to vector<16x8xf32>
    %167 = vector.extract_strided_slice %162 {offsets = [2, 0, 0], sizes = [1, 16, 8], strides = [1, 1, 1]} : vector<4x16x8xf32> to vector<1x16x8xf32>
    %168 = vector.shape_cast %167 : vector<1x16x8xf32> to vector<16x8xf32>
    %169 = vector.extract_strided_slice %162 {offsets = [3, 0, 0], sizes = [1, 16, 8], strides = [1, 1, 1]} : vector<4x16x8xf32> to vector<1x16x8xf32>
    %170 = vector.shape_cast %169 : vector<1x16x8xf32> to vector<16x8xf32>
    %171 = tpu.concatenate %164, %166, %168, %170 in 1 : vector<16x8xf32>, vector<16x8xf32>, vector<16x8xf32>, vector<16x8xf32> -> vector<16x32xf32>
    %c0_52 = arith.constant 0 : index
    %c0_53 = arith.constant 0 : index
    %172 = vector.load %arg13[%c0_52, %c0_53] : memref<32x32xf32, #tpu.memory_space<vmem>>, vector<32x32xf32>
    %cst_54 = arith.constant dense<0.000000e+00> : vector<16x32xf32>
    %173 = tpu.matmul %171, %172, %cst_54 {dimension_numbers = #tpu.dot_dimension_numbers<[1], [0], [0], [1], [0, 0, 1, 1], [], []>} : vector<16x32xf32>, vector<32x32xf32>, vector<16x32xf32> -> vector<16x32xf32>
    %c0_55 = arith.constant 0 : index
    %c0_56 = arith.constant 0 : index
    %174 = vector.load %arg14[%c0_55, %c0_56] : memref<1x32xf32, #tpu.memory_space<vmem>>, vector<1x32xf32>
    %175 = vector.broadcast %174 : vector<1x32xf32> to vector<16x32xf32>
    %176 = arith.addf %173, %175 : vector<16x32xf32>
    %c0_57 = arith.constant 0 : index
    %c0_58 = arith.constant 0 : index
    %177 = vector.load %arg17[%c0_57, %c0_58] : memref<1x32xf32, #tpu.memory_space<vmem>>, vector<1x32xf32>
    %c0_59 = arith.constant 0 : index
    %c0_60 = arith.constant 0 : index
    %178 = vector.load %arg18[%c0_59, %c0_60] : memref<1x32xf32, #tpu.memory_space<vmem>>, vector<1x32xf32>
    %179 = arith.addf %102, %176 : vector<16x32xf32>
    %cst_61 = arith.constant dense<0.000000e+00> : vector<16xf32>
    %180 = vector.multi_reduction <add>, %179, %cst_61 [1] : vector<16x32xf32> to vector<16xf32>
    %181 = vector.shape_cast %180 : vector<16xf32> to vector<16x1xf32>
    %cst_62 = arith.constant 3.200000e+01 : f32
    %182 = vector.broadcast %cst_62 : f32 to vector<16x1xf32>
    %183 = arith.divf %181, %182 : vector<16x1xf32>
    %184 = vector.broadcast %183 : vector<16x1xf32> to vector<16x32xf32>
    %185 = arith.subf %179, %184 : vector<16x32xf32>
    %186 = arith.mulf %185, %185 : vector<16x32xf32>
    %cst_63 = arith.constant dense<0.000000e+00> : vector<16xf32>
    %187 = vector.multi_reduction <add>, %186, %cst_63 [1] : vector<16x32xf32> to vector<16xf32>
    %188 = vector.shape_cast %187 : vector<16xf32> to vector<16x1xf32>
    %cst_64 = arith.constant 3.200000e+01 : f32
    %189 = vector.broadcast %cst_64 : f32 to vector<16x1xf32>
    %190 = arith.divf %188, %189 : vector<16x1xf32>
    %cst_65 = arith.constant 9.99999974E-6 : f32
    %191 = vector.broadcast %cst_65 : f32 to vector<16x1xf32>
    %192 = arith.addf %190, %191 : vector<16x1xf32>
    %193 = math.rsqrt %192 : vector<16x1xf32>
    %194 = vector.broadcast %193 : vector<16x1xf32> to vector<16x32xf32>
    %195 = arith.mulf %185, %194 : vector<16x32xf32>
    %196 = vector.broadcast %177 : vector<1x32xf32> to vector<16x32xf32>
    %197 = arith.mulf %195, %196 : vector<16x32xf32>
    %198 = vector.broadcast %178 : vector<1x32xf32> to vector<16x32xf32>
    %199 = arith.addf %197, %198 : vector<16x32xf32>
    %200 = vector.broadcast %5 : vector<16x1xf32> to vector<16x32xf32>
    %201 = arith.mulf %199, %200 : vector<16x32xf32>
    %202 = vector.shape_cast %160 : vector<8x8x16xf32> to vector<4x16x16xf32>
    %203 = vector.extract_strided_slice %202 {offsets = [0, 0, 0], sizes = [1, 16, 16], strides = [1, 1, 1]} : vector<4x16x16xf32> to vector<1x16x16xf32>
    %204 = vector.shape_cast %203 : vector<1x16x16xf32> to vector<16x16xf32>
    %205 = vector.extract_strided_slice %202 {offsets = [1, 0, 0], sizes = [1, 16, 16], strides = [1, 1, 1]} : vector<4x16x16xf32> to vector<1x16x16xf32>
    %206 = vector.shape_cast %205 : vector<1x16x16xf32> to vector<16x16xf32>
    %207 = vector.extract_strided_slice %202 {offsets = [2, 0, 0], sizes = [1, 16, 16], strides = [1, 1, 1]} : vector<4x16x16xf32> to vector<1x16x16xf32>
    %208 = vector.shape_cast %207 : vector<1x16x16xf32> to vector<16x16xf32>
    %209 = vector.extract_strided_slice %202 {offsets = [3, 0, 0], sizes = [1, 16, 16], strides = [1, 1, 1]} : vector<4x16x16xf32> to vector<1x16x16xf32>
    %210 = vector.shape_cast %209 : vector<1x16x16xf32> to vector<16x16xf32>
    %211 = tpu.concatenate %204, %206, %208, %210 in 1 : vector<16x16xf32>, vector<16x16xf32>, vector<16x16xf32>, vector<16x16xf32> -> vector<16x64xf32>
    %212 = vector.shape_cast %211 : vector<16x64xf32> to vector<2x8x64xf32>
    %c0_66 = arith.constant 0 : index
    %c0_67 = arith.constant 0 : index
    %c0_68 = arith.constant 0 : index
    %213 = vector.load %arg26[%c0_66, %c0_67, %c0_68] : memref<2x8x64xf32, #tpu.memory_space<vmem>>, vector<2x8x64xf32>
    tpu.vector_store %arg26[%c0_66, %c0_67, %c0_68], %212 {strides = array<i32>} : memref<2x8x64xf32, #tpu.memory_space<vmem>>, vector<2x8x64xf32>,
    %c0_69 = arith.constant 0 : index
    %c0_70 = arith.constant 0 : index
    %214 = vector.load %arg19[%c0_69, %c0_70] : memref<32x64xf32, #tpu.memory_space<vmem>>, vector<32x64xf32>
    %cst_71 = arith.constant dense<0.000000e+00> : vector<16x64xf32>
    %215 = tpu.matmul %201, %214, %cst_71 {dimension_numbers = #tpu.dot_dimension_numbers<[1], [0], [0], [1], [0, 0, 1, 1], [], []>} : vector<16x32xf32>, vector<32x64xf32>, vector<16x64xf32> -> vector<16x64xf32>
    %c0_72 = arith.constant 0 : index
    %c0_73 = arith.constant 0 : index
    %216 = vector.load %arg20[%c0_72, %c0_73] : memref<1x64xf32, #tpu.memory_space<vmem>>, vector<1x64xf32>
    %217 = vector.broadcast %216 : vector<1x64xf32> to vector<16x64xf32>
    %218 = arith.addf %215, %217 : vector<16x64xf32>
    %cst_74 = arith.constant 0.000000e+00 : f32
    %219 = vector.broadcast %cst_74 : f32 to vector<16x64xf32>
    %220 = arith.maximumf %218, %219 : vector<16x64xf32>
    %c0_75 = arith.constant 0 : index
    %c0_76 = arith.constant 0 : index
    %221 = vector.load %arg21[%c0_75, %c0_76] : memref<64x32xf32, #tpu.memory_space<vmem>>, vector<64x32xf32>
    %cst_77 = arith.constant dense<0.000000e+00> : vector<16x32xf32>
    %222 = tpu.matmul %220, %221, %cst_77 {dimension_numbers = #tpu.dot_dimension_numbers<[1], [0], [0], [1], [0, 0, 1, 1], [], []>} : vector<16x64xf32>, vector<64x32xf32>, vector<16x32xf32> -> vector<16x32xf32>
    %c0_78 = arith.constant 0 : index
    %c0_79 = arith.constant 0 : index
    %223 = vector.load %arg22[%c0_78, %c0_79] : memref<1x32xf32, #tpu.memory_space<vmem>>, vector<1x32xf32>
    %224 = vector.broadcast %223 : vector<1x32xf32> to vector<16x32xf32>
    %225 = arith.addf %222, %224 : vector<16x32xf32>
    %c0_80 = arith.constant 0 : index
    %c0_81 = arith.constant 0 : index
    %226 = vector.load %arg23[%c0_80, %c0_81] : memref<1x32xf32, #tpu.memory_space<vmem>>, vector<1x32xf32>
    %c0_82 = arith.constant 0 : index
    %c0_83 = arith.constant 0 : index
    %227 = vector.load %arg24[%c0_82, %c0_83] : memref<1x32xf32, #tpu.memory_space<vmem>>, vector<1x32xf32>
    %228 = arith.addf %201, %225 : vector<16x32xf32>
    %cst_84 = arith.constant dense<0.000000e+00> : vector<16xf32>
    %229 = vector.multi_reduction <add>, %228, %cst_84 [1] : vector<16x32xf32> to vector<16xf32>
    %230 = vector.shape_cast %229 : vector<16xf32> to vector<16x1xf32>
    %cst_85 = arith.constant 3.200000e+01 : f32
    %231 = vector.broadcast %cst_85 : f32 to vector<16x1xf32>
    %232 = arith.divf %230, %231 : vector<16x1xf32>
    %233 = vector.broadcast %232 : vector<16x1xf32> to vector<16x32xf32>
    %234 = arith.subf %228, %233 : vector<16x32xf32>
    %235 = arith.mulf %234, %234 : vector<16x32xf32>
    %cst_86 = arith.constant dense<0.000000e+00> : vector<16xf32>
    %236 = vector.multi_reduction <add>, %235, %cst_86 [1] : vector<16x32xf32> to vector<16xf32>
    %237 = vector.shape_cast %236 : vector<16xf32> to vector<16x1xf32>
    %cst_87 = arith.constant 3.200000e+01 : f32
    %238 = vector.broadcast %cst_87 : f32 to vector<16x1xf32>
    %239 = arith.divf %237, %238 : vector<16x1xf32>
    %cst_88 = arith.constant 9.99999974E-6 : f32
    %240 = vector.broadcast %cst_88 : f32 to vector<16x1xf32>
    %241 = arith.addf %239, %240 : vector<16x1xf32>
    %242 = math.rsqrt %241 : vector<16x1xf32>
    %243 = vector.broadcast %242 : vector<16x1xf32> to vector<16x32xf32>
    %244 = arith.mulf %234, %243 : vector<16x32xf32>
    %245 = vector.broadcast %226 : vector<1x32xf32> to vector<16x32xf32>
    %246 = arith.mulf %244, %245 : vector<16x32xf32>
    %247 = vector.broadcast %227 : vector<1x32xf32> to vector<16x32xf32>
    %248 = arith.addf %246, %247 : vector<16x32xf32>
    %249 = vector.broadcast %5 : vector<16x1xf32> to vector<16x32xf32>
    %250 = arith.mulf %248, %249 : vector<16x32xf32>
    %251 = vector.shape_cast %250 : vector<16x32xf32> to vector<2x8x32xf32>
    %c0_89 = arith.constant 0 : index
    %c0_90 = arith.constant 0 : index
    %c0_91 = arith.constant 0 : index
    %252 = vector.load %arg25[%c0_89, %c0_90, %c0_91] : memref<2x8x32xf32, #tpu.memory_space<vmem>>, vector<2x8x32xf32>
    tpu.vector_store %arg25[%c0_89, %c0_90, %c0_91], %251 {strides = array<i32>} : memref<2x8x32xf32, #tpu.memory_space<vmem>>, vector<2x8x32xf32>,
    return
  }
}

</mosaic_0001>

<bundles_post_ra>
// kernel: decoder_layer.1
= control target key start
LH: loop header
LB: loop body
LE: loop exit
PB: predicated region body
PF: predicated region fallthrough
CT: control target
= control target key end

     0   :  { %s6122_s0 = inlined_call_operand.vmem [shape: f32[2,8,32], index: 0, kind: input, shape index: {}]   ;;  %s6123_s1 = inlined_call_operand.vmem [shape: f32[2,16,32], index: 1, kind: input, shape index: {}]   ;;  %s6124_s2 = inlined_call_operand.vmem [shape: f32[2,8,8], index: 2, kind: input, shape index: {}]   ;;  %s6125_s3 = inlined_call_operand.hbm [shape: f32[2,8,16], index: 3, kind: input, shape index: {}]   ;;  %s6126_s4 = inlined_call_operand.vmem [shape: f32[2,8,1], index: 4, kind: input, shape index: {}]   ;;  %s6127_s5 = inlined_call_operand.vmem [shape: f32[32,96], index: 5, kind: input, shape index: {}]   ;;  %s6128_s6 = inlined_call_operand.vmem [shape: f32[1,96], index: 6, kind: input, shape index: {}]   ;;  %s6129_s7 = inlined_call_operand.vmem [shape: f32[32,32], index: 7, kind: input, shape index: {}]   ;;  %s6130_s8 = inlined_call_operand.hbm [shape: f32[1,32], index: 8, kind: input, shape index: {}]   ;;  %s6131_s9 = inlined_call_operand.hbm [shape: f32[32,32], index: 9, kind: input, shape index: {}]   ;;  %s6132_s10 = inlined_call_operand.hbm [shape: f32[1,32], index: 10, kind: input, shape index: {}]   ;;  %s6133_s11 = inlined_call_operand.hbm [shape: f32[32,64], index: 11, kind: input, shape index: {}]   ;;  %s6134_s12 = inlined_call_operand.hbm [shape: f32[1,64], index: 12, kind: input, shape index: {}]   ;;  %s6135_s13 = inlined_call_operand.hbm [shape: f32[32,32], index: 13, kind: input, shape index: {}]   ;;  %s6136_s14 = inlined_call_operand.hbm [shape: f32[1,32], index: 14, kind: input, shape index: {}]   ;;  %s6137_s15 = inlined_call_operand.hbm [shape: f32[1,32], index: 15, kind: input, shape index: {}]   ;;  %s6138_s16 = inlined_call_operand.hbm [shape: f32[1,32], index: 16, kind: input, shape index: {}]   ;;  %s6139_s17 = inlined_call_operand.hbm [shape: f32[1,32], index: 17, kind: input, shape index: {}]   ;;  %s6140_s18 = inlined_call_operand.hbm [shape: f32[1,32], index: 18, kind: input, shape index: {}]   ;;  %s6141_s19 = inlined_call_operand.vmem [shape: f32[32,64], index: 19, kind: input, shape index: {}]   ;;  %s6142_s20 = inlined_call_operand.hbm [shape: f32[1,64], index: 20, kind: input, shape index: {}]   ;;  %s6143_s21 = inlined_call_operand.vmem [shape: f32[64,32], index: 21, kind: input, shape index: {}]   ;;  %s6144_s22 = inlined_call_operand.hbm [shape: f32[1,32], index: 22, kind: input, shape index: {}]   ;;  %s6145_s23 = inlined_call_operand.hbm [shape: f32[1,32], index: 23, kind: input, shape index: {}]   ;;  %s6146_s24 = inlined_call_operand.hbm [shape: f32[1,32], index: 24, kind: input, shape index: {}]   ;;  %s6147_s25 = inlined_call_operand.hbm [shape: f32[2,8,32], index: 25, kind: output, shape index: {0}]   ;;  %s6148_s26 = inlined_call_operand.vmem [shape: f32[2,8,64], index: 26, kind: output, shape index: {1}]  }
   0x1   :  { %6159 = sst [smem:[#allocation39_spill]] %s6122_s0 }
   0x2   :  { %6160 = sst [smem:[#allocation40_spill]] %s6123_s1 }
   0x3   :  { %6161 = sst [smem:[#allocation41_spill]] %s6124_s2 }
   0x4   :  { %6162 = sst [smem:[#allocation42_spill]] %s6125_s3 }
   0x5   :  { %6163 = sst [smem:[#allocation43_spill]] %s6126_s4 }
   0x6   :  { %6164 = sst [smem:[#allocation44_spill]] %s6127_s5 }
   0x7   :  { %6165 = sst [smem:[#allocation45_spill]] %s6128_s6 }
   0x8   :  { %6166 = sst [smem:[#allocation46_spill]] %s6129_s7 }
   0x9   :  { %6167 = sst [smem:[#allocation47_spill]] %s6130_s8 }
   0xa   :  { %6168 = sst [smem:[#allocation48_spill]] %s6131_s9 }
   0xb   :  { %6169 = sst [smem:[#allocation49_spill]] %s6132_s10 }
   0xc   :  { %32 = vsyncpa [#allocation3], 0 }
   0xd   :  { %33 = vsyncpa [#allocation6], 0 }
   0xe   :  { %34 = vsyncpa [#allocation9], 0 }
   0xf   :  { %35 = vsyncpa [#allocation12], 0 }
  0x10   :  { %36 = vsyncpa [#allocation15], 0 }
  0x11   :  { %37 = vsyncpa [#allocation18], 0 }
  0x12   :  { %38 = vsyncpa [#allocation21], 0 }
  0x13   :  { %39 = vsyncpa [#allocation24], 0 }
  0x14   :  { %40 = vsyncpa [#allocation27], 0 }
  0x15   :  { %41 = vsyncpa [#allocation4], 0  ;;  %s5139_s27 = smov [#allocation5]   ;;  %s5140_s7 = smov [#allocation8]  }
  0x16   :  { %s74_s3 = sshll.u32 %s5139_s27, 4  ;;  %s96_s28 = sshll.u32 %s5140_s7, 4  ;;  %s75_s3 = int_to_ptr.vmem [resolvable:$true] %s74_s3  ;;  %s97_s28 = int_to_ptr.vmem [resolvable:$true] %s96_s28 }
  0x17   :  { %s6170_s29 = sld [smem:[#allocation47_spill]] }
  0x1d   :  { %s4745_s0 = scalar_lea.hbm %s6170_s29, 16 }
  0x1e   :  { %p4746_p0 = scmp.ne.s32.totalorder %s6170_s29, %s4745_s0  ;;  %p4749_p1 = scmp.lt.u32.totalorder %s4745_s0, %s6170_s29 }
  0x20   :  { %p4751_p2 = pnand %p4749_p1, %p4746_p0 }
  0x22   :  { %4754 = shalt.err (!%p4751_p2)
}
  0x23   :  { %s4755_s10 = scalar_lea.vmem %s75_s3, 16  ;;  %s4759_s6 = scalar_lea.vmem %s75_s3, 32 }
  0x24   :  { %p4756_p3 = scmp.ne.s32.totalorder %s75_s3, %s4755_s10  ;;  %p4760_p4 = scmp.lt.s32.totalorder %s75_s3, %s75_s3 }
  0x25   :  { %p4761_p5 = scmp.lt.s32.totalorder %s4759_s6, %s4755_s10 }
  0x27   :  { %p4762_p6 = por %p4761_p5, %p4760_p4 }
  0x29   :  { %p4763_p7 = pnand %p4762_p6, %p4756_p3 }
  0x2b   :  { %4766 = shalt.err (!%p4763_p7)
}
  0x2c   :  { %77 = dma.hbm_to_vmem [thread:$0]  %s6170_s29, 16, %s75_s3, [#allocation6]  }
  0x2d   :  { %s6171_s4 = sld [smem:[#allocation49_spill]] }
  0x33   :  { %s4767_s9 = scalar_lea.hbm %s6171_s4, 16 }
  0x34   :  { %p4768_p8 = scmp.ne.s32.totalorder %s6171_s4, %s4767_s9  ;;  %p4771_p9 = scmp.lt.u32.totalorder %s4767_s9, %s6171_s4 }
  0x36   :  { %p4773_p10 = pnand %p4771_p9, %p4768_p8 }
  0x38   :  { %4776 = shalt.err (!%p4773_p10)
}
  0x39   :  { %s4777_s10 = scalar_lea.vmem %s97_s28, 16  ;;  %s4781_s6 = scalar_lea.vmem %s97_s28, 32 }
  0x3a   :  { %p4778_p11 = scmp.ne.s32.totalorder %s97_s28, %s4777_s10  ;;  %p4782_p12 = scmp.lt.s32.totalorder %s97_s28, %s97_s28 }
  0x3b   :  { %p4783_p13 = scmp.lt.s32.totalorder %s4781_s6, %s4777_s10 }
  0x3d   :  { %p4784_p0 = por %p4783_p13, %p4782_p12 }
  0x3f   :  { %p4785_p1 = pnand %p4784_p0, %p4778_p11 }
  0x41   :  { %4788 = shalt.err (!%p4785_p1)
}
  0x42   :  { %99 = dma.hbm_to_vmem [thread:$0]  %s6171_s4, 16, %s97_s28, [#allocation9]  }
  0x43   :  { %s5141_s1 = smov [#allocation11]   ;;  %s5142_s7 = smov [#allocation14]  }
  0x44   :  { %s118_s27 = sshll.u32 %s5141_s1, 4  ;;  %s140_s8 = sshll.u32 %s5142_s7, 4  ;;  %s119_s27 = int_to_ptr.vmem [resolvable:$true] %s118_s27  ;;  %s141_s8 = int_to_ptr.vmem [resolvable:$true] %s140_s8 }
  0x45   :  { %s4789_s0 = scalar_lea.hbm %s6134_s12, 16 }
  0x46   :  { %p4790_p2 = scmp.ne.s32.totalorder %s6134_s12, %s4789_s0  ;;  %p4793_p3 = scmp.lt.u32.totalorder %s4789_s0, %s6134_s12 }
  0x48   :  { %p4795_p4 = pnand %p4793_p3, %p4790_p2 }
  0x4a   :  { %4798 = shalt.err (!%p4795_p4)
}
  0x4b   :  { %s4799_s28 = scalar_lea.vmem %s119_s27, 16  ;;  %s4803_s4 = scalar_lea.vmem %s119_s27, 32 }
  0x4c   :  { %p4800_p5 = scmp.ne.s32.totalorder %s119_s27, %s4799_s28  ;;  %p4804_p6 = scmp.lt.s32.totalorder %s119_s27, %s119_s27 }
  0x4d   :  { %p4805_p7 = scmp.lt.s32.totalorder %s4803_s4, %s4799_s28 }
  0x4f   :  { %p4806_p8 = por %p4805_p7, %p4804_p6 }
  0x51   :  { %p4807_p9 = pnand %p4806_p8, %p4800_p5 }
  0x53   :  { %4810 = shalt.err (!%p4807_p9)
}
  0x54   :  { %121 = dma.hbm_to_vmem [thread:$0]  %s6134_s12, 16, %s119_s27, [#allocation12]  }
  0x55   :  { %s4811_s9 = scalar_lea.hbm %s6136_s14, 16 }
  0x56   :  { %p4812_p10 = scmp.ne.s32.totalorder %s6136_s14, %s4811_s9  ;;  %p4815_p11 = scmp.lt.u32.totalorder %s4811_s9, %s6136_s14 }
  0x58   :  { %p4817_p12 = pnand %p4815_p11, %p4812_p10 }
  0x5a   :  { %4820 = shalt.err (!%p4817_p12)
}
  0x5b   :  { %s4821_s10 = scalar_lea.vmem %s141_s8, 16  ;;  %s4825_s6 = scalar_lea.vmem %s141_s8, 32 }
  0x5c   :  { %p4822_p13 = scmp.ne.s32.totalorder %s141_s8, %s4821_s10  ;;  %p4826_p0 = scmp.lt.s32.totalorder %s141_s8, %s141_s8 }
  0x5d   :  { %p4827_p1 = scmp.lt.s32.totalorder %s4825_s6, %s4821_s10 }
  0x5f   :  { %p4828_p2 = por %p4827_p1, %p4826_p0 }
  0x61   :  { %p4829_p3 = pnand %p4828_p2, %p4822_p13 }
  0x63   :  { %4832 = shalt.err (!%p4829_p3)
}
  0x64   :  { %143 = dma.hbm_to_vmem [thread:$0]  %s6136_s14, 16, %s141_s8, [#allocation15]  }
  0x65   :  { %s5143_s28 = smov [#allocation17]   ;;  %s5144_s3 = smov [#allocation20]  }
  0x66   :  { %s160_s4 = sshll.u32 %s5143_s28, 4  ;;  %s180_s29 = sshll.u32 %s5144_s3, 4  ;;  %s161_s4 = int_to_ptr.vmem [resolvable:$true] %s160_s4  ;;  %s181_s29 = int_to_ptr.vmem [resolvable:$true] %s180_s29 }
  0x67   :  { %s4833_s9 = scalar_lea.hbm %s6138_s16, 16 }
  0x68   :  { %p4834_p4 = scmp.ne.s32.totalorder %s6138_s16, %s4833_s9  ;;  %p4837_p5 = scmp.lt.u32.totalorder %s4833_s9, %s6138_s16 }
  0x6a   :  { %p4839_p6 = pnand %p4837_p5, %p4834_p4 }
  0x6c   :  { %4842 = shalt.err (!%p4839_p6)
}
  0x6d   :  { %s4843_s14 = scalar_lea.vmem %s161_s4, 16  ;;  %s4847_s8 = scalar_lea.vmem %s161_s4, 32 }
  0x6e   :  { %p4844_p7 = scmp.ne.s32.totalorder %s161_s4, %s4843_s14  ;;  %p4848_p8 = scmp.lt.s32.totalorder %s161_s4, %s161_s4 }
  0x6f   :  { %p4849_p9 = scmp.lt.s32.totalorder %s4847_s8, %s4843_s14 }
  0x71   :  { %p4850_p10 = por %p4849_p9, %p4848_p8 }
  0x73   :  { %p4851_p11 = pnand %p4850_p10, %p4844_p7 }
  0x75   :  { %4854 = shalt.err (!%p4851_p11)
}
  0x76   :  { %163 = dma.hbm_to_vmem [thread:$0]  %s6138_s16, 16, %s161_s4, [#allocation18]  }
  0x77   :  { %s4855_s28 = scalar_lea.hbm %s6140_s18, 16 }
  0x78   :  { %p4856_p12 = scmp.ne.s32.totalorder %s6140_s18, %s4855_s28  ;;  %p4859_p13 = scmp.lt.u32.totalorder %s4855_s28, %s6140_s18 }
  0x7a   :  { %p4861_p0 = pnand %p4859_p13, %p4856_p12 }
  0x7c   :  { %4864 = shalt.err (!%p4861_p0)
}
  0x7d   :  { %s4865_s30 = scalar_lea.vmem %s181_s29, 16  ;;  %s4869_s0 = scalar_lea.vmem %s181_s29, 32 }
  0x7e   :  { %p4866_p1 = scmp.ne.s32.totalorder %s181_s29, %s4865_s30  ;;  %p4870_p2 = scmp.lt.s32.totalorder %s181_s29, %s181_s29 }
  0x7f   :  { %p4871_p3 = scmp.lt.s32.totalorder %s4869_s0, %s4865_s30 }
  0x81   :  { %p4872_p4 = por %p4871_p3, %p4870_p2 }
  0x83   :  { %p4873_p5 = pnand %p4872_p4, %p4866_p1 }
  0x85   :  { %4876 = shalt.err (!%p4873_p5)
}
  0x86   :  { %183 = dma.hbm_to_vmem [thread:$0]  %s6140_s18, 16, %s181_s29, [#allocation21]  }
  0x87   :  { %s5145_s2 = smov [#allocation23]   ;;  %s5146_s14 = smov [#allocation2]  }
  0x88   :  { %s204_s5 = sshll.u32 %s5145_s2, 4  ;;  %s53_s8 = sshll.u32 %s5146_s14, 4  ;;  %s205_s5 = int_to_ptr.vmem [resolvable:$true] %s204_s5  ;;  %s5378_s8 = int_to_ptr.vmem [resolvable:$true] %s53_s8 }
  0x89   :  { %s4877_s12 = scalar_lea.hbm %s6144_s22, 16 }
  0x8a   :  { %p4878_p6 = scmp.ne.s32.totalorder %s6144_s22, %s4877_s12  ;;  %p4881_p7 = scmp.lt.u32.totalorder %s4877_s12, %s6144_s22 }
  0x8c   :  { %p4883_p8 = pnand %p4881_p7, %p4878_p6 }
  0x8e   :  { %4886 = shalt.err (!%p4883_p8)
}
  0x8f   :  { %s4887_s18 = scalar_lea.vmem %s205_s5, 16  ;;  %s4891_s29 = scalar_lea.vmem %s205_s5, 32 }
  0x90   :  { %p4888_p9 = scmp.ne.s32.totalorder %s205_s5, %s4887_s18  ;;  %p4892_p10 = scmp.lt.s32.totalorder %s205_s5, %s205_s5 }
  0x91   :  { %p4893_p11 = scmp.lt.s32.totalorder %s4891_s29, %s4887_s18 }
  0x93   :  { %p4894_p12 = por %p4893_p11, %p4892_p10 }
  0x95   :  { %p4895_p13 = pnand %p4894_p12, %p4888_p9 }
  0x97   :  { %4898 = shalt.err (!%p4895_p13)
}
  0x98   :  { %207 = dma.hbm_to_vmem [thread:$0]  %s6144_s22, 16, %s205_s5, [#allocation24]  }
  0x99   :  { %s6172_s16 = sld [smem:[#allocation42_spill]] }
  0x9f   :  { %s4899_s4 = scalar_lea.hbm %s6172_s16, 256 }
  0xa0   :  { %p4900_p0 = scmp.ne.s32.totalorder %s6172_s16, %s4899_s4  ;;  %p4903_p1 = scmp.lt.u32.totalorder %s4899_s4, %s6172_s16 }
  0xa2   :  { %p4905_p2 = pnand %p4903_p1, %p4900_p0 }
  0xa4   :  { %4908 = shalt.err (!%p4905_p2)
}
  0xa5   :  { %s4909_s12 = scalar_lea.vmem %s5378_s8, 256  ;;  %p4914_p4 = scmp.lt.s32.totalorder %s5378_s8, %s5378_s8 }
  0xa6   :  { %p4910_p3 = scmp.ne.s32.totalorder %s5378_s8, %s4909_s12  ;;  %p4915_p5 = scmp.lt.s32.totalorder %s4909_s12, %s4909_s12 }
  0xa8   :  { %p4916_p6 = por %p4915_p5, %p4914_p4 }
  0xaa   :  { %p4917_p7 = pnand %p4916_p6, %p4910_p3 }
  0xac   :  { %4920 = shalt.err (!%p4917_p7)
}
  0xad   :  { %s5147_s22 = smov 128   ;;  %s5148_s5 = smov 8  }
  0xae   :  { %59 = dma.hbm_to_vmem [thread:$0]  %s6172_s16, 256, %s5378_s8, [#allocation3], %s5147_s22, %s5147_s22, %s5148_s5  }
  0xaf   :  { %s5149_s3 = smov [#allocation7]   ;;  %s5150_s18 = smov [#allocation10]  }
  0xb0   :  { %s83_s1 = sshll.u32 %s5149_s3, 4  ;;  %s105_s29 = sshll.u32 %s5150_s18, 4  ;;  %s84_s1 = int_to_ptr.vmem [resolvable:$true] %s83_s1  ;;  %s5412_s29 = int_to_ptr.vmem [resolvable:$true] %s105_s29 }
  0xb1   :  { %s6173_s30 = sld [smem:[#allocation48_spill]] }
  0xb7   :  { %s4921_s0 = scalar_lea.hbm %s6173_s30, 512 }
  0xb8   :  { %p4922_p8 = scmp.ne.s32.totalorder %s6173_s30, %s4921_s0  ;;  %p4925_p9 = scmp.lt.u32.totalorder %s4921_s0, %s6173_s30 }
  0xba   :  { %p4927_p10 = pnand %p4925_p9, %p4922_p8 }
  0xbc   :  { %4930 = shalt.err (!%p4927_p10)
}
  0xbd   :  { %s4931_s8 = scalar_lea.vmem %s84_s1, 512  ;;  %p4936_p12 = scmp.lt.s32.totalorder %s84_s1, %s84_s1 }
  0xbe   :  { %p4932_p11 = scmp.ne.s32.totalorder %s84_s1, %s4931_s8  ;;  %p4937_p13 = scmp.lt.s32.totalorder %s4931_s8, %s4931_s8 }
  0xc0   :  { %p4938_p0 = por %p4937_p13, %p4936_p12 }
  0xc2   :  { %p4939_p1 = pnand %p4938_p0, %p4932_p11 }
  0xc4   :  { %4942 = shalt.err (!%p4939_p1)
}
  0xc5   :  { %89 = dma.hbm_to_vmem [thread:$0]  %s6173_s30, 512, %s84_s1, [#allocation6], %s5147_s22, %s5147_s22, %s5148_s5  }
  0xc6   :  { %s4943_s28 = scalar_lea.hbm %s6133_s11, 512 }
  0xc7   :  { %p4944_p2 = scmp.ne.s32.totalorder %s6133_s11, %s4943_s28  ;;  %p4947_p3 = scmp.lt.u32.totalorder %s4943_s28, %s6133_s11 }
  0xc9   :  { %p4949_p4 = pnand %p4947_p3, %p4944_p2 }
  0xcb   :  { %4952 = shalt.err (!%p4949_p4)
}
  0xcc   :  { %s4953_s0 = scalar_lea.vmem %s5412_s29, 512  ;;  %p4958_p6 = scmp.lt.s32.totalorder %s5412_s29, %s5412_s29 }
  0xcd   :  { %p4954_p5 = scmp.ne.s32.totalorder %s5412_s29, %s4953_s0  ;;  %p4959_p7 = scmp.lt.s32.totalorder %s4953_s0, %s4953_s0 }
  0xcf   :  { %p4960_p8 = por %p4959_p7, %p4958_p6 }
  0xd1   :  { %p4961_p9 = pnand %p4960_p8, %p4954_p5 }
  0xd3   :  { %4964 = shalt.err (!%p4961_p9)
}
  0xd4   :  { %111 = dma.hbm_to_vmem [thread:$0]  %s6133_s11, 512, %s5412_s29, [#allocation9], %s5147_s22, %s5147_s22, %s5148_s5  }
  0xd5   :  { %s5151_s4 = smov [#allocation13]   ;;  %s5152_s14 = smov [#allocation16]  }
  0xd6   :  { %s127_s2 = sshll.u32 %s5151_s4, 4  ;;  %s150_s10 = sshll.u32 %s5152_s14, 4  ;;  %s128_s2 = int_to_ptr.vmem [resolvable:$true] %s127_s2  ;;  %s151_s10 = int_to_ptr.vmem [resolvable:$true] %s150_s10 }
  0xd7   :  { %s4965_s6 = scalar_lea.hbm %s6135_s13, 512 }
  0xd8   :  { %p4966_p10 = scmp.ne.s32.totalorder %s6135_s13, %s4965_s6  ;;  %p4969_p11 = scmp.lt.u32.totalorder %s4965_s6, %s6135_s13 }
  0xda   :  { %p4971_p12 = pnand %p4969_p11, %p4966_p10 }
  0xdc   :  { %4974 = shalt.err (!%p4971_p12)
}
  0xdd   :  { %s4975_s11 = scalar_lea.vmem %s128_s2, 512  ;;  %p4980_p0 = scmp.lt.s32.totalorder %s128_s2, %s128_s2 }
  0xde   :  { %p4976_p13 = scmp.ne.s32.totalorder %s128_s2, %s4975_s11  ;;  %p4981_p1 = scmp.lt.s32.totalorder %s4975_s11, %s4975_s11 }
  0xe0   :  { %p4982_p2 = por %p4981_p1, %p4980_p0 }
  0xe2   :  { %p4983_p3 = pnand %p4982_p2, %p4976_p13 }
  0xe4   :  { %4986 = shalt.err (!%p4983_p3)
}
  0xe5   :  { %133 = dma.hbm_to_vmem [thread:$0]  %s6135_s13, 512, %s128_s2, [#allocation12], %s5147_s22, %s5147_s22, %s5148_s5  }
  0xe6   :  { %s4987_s0 = scalar_lea.hbm %s6137_s15, 16 }
  0xe7   :  { %p4988_p4 = scmp.ne.s32.totalorder %s6137_s15, %s4987_s0  ;;  %p4991_p5 = scmp.lt.u32.totalorder %s4987_s0, %s6137_s15 }
  0xe9   :  { %p4993_p6 = pnand %p4991_p5, %p4988_p4 }
  0xeb   :  { %4996 = shalt.err (!%p4993_p6)
}
  0xec   :  { %s4997_s8 = scalar_lea.vmem %s151_s10, 16  ;;  %s5001_s16 = scalar_lea.vmem %s151_s10, 32 }
  0xed   :  { %p4998_p7 = scmp.ne.s32.totalorder %s151_s10, %s4997_s8  ;;  %p5002_p8 = scmp.lt.s32.totalorder %s151_s10, %s151_s10 }
  0xee   :  { %p5003_p9 = scmp.lt.s32.totalorder %s5001_s16, %s4997_s8 }
  0xf0   :  { %p5004_p10 = por %p5003_p9, %p5002_p8 }
  0xf2   :  { %p5005_p11 = pnand %p5004_p10, %p4998_p7 }
  0xf4   :  { %5008 = shalt.err (!%p5005_p11)
}
  0xf5   :  { %153 = dma.hbm_to_vmem [thread:$0]  %s6137_s15, 16, %s151_s10, [#allocation15]  }
  0xf6   :  { %s5153_s6 = smov [#allocation19]   ;;  %s5154_s27 = smov [#allocation22]  }
  0xf7   :  { %s170_s12 = sshll.u32 %s5153_s6, 4  ;;  %s192_s28 = sshll.u32 %s5154_s27, 4  ;;  %s171_s12 = int_to_ptr.vmem [resolvable:$true] %s170_s12  ;;  %s193_s28 = int_to_ptr.vmem [resolvable:$true] %s192_s28 }
  0xf8   :  { %s5009_s29 = scalar_lea.hbm %s6139_s17, 16 }
  0xf9   :  { %p5010_p12 = scmp.ne.s32.totalorder %s6139_s17, %s5009_s29  ;;  %p5013_p13 = scmp.lt.u32.totalorder %s5009_s29, %s6139_s17 }
  0xfb   :  { %p5015_p0 = pnand %p5013_p13, %p5010_p12 }
  0xfd   :  { %5018 = shalt.err (!%p5015_p0)
}
  0xfe   :  { %s5019_s15 = scalar_lea.vmem %s171_s12, 16  ;;  %s5023_s10 = scalar_lea.vmem %s171_s12, 32 }
  0xff   :  { %p5020_p1 = scmp.ne.s32.totalorder %s171_s12, %s5019_s15  ;;  %p5024_p2 = scmp.lt.s32.totalorder %s171_s12, %s171_s12 }
 0x100   :  { %p5025_p3 = scmp.lt.s32.totalorder %s5023_s10, %s5019_s15 }
 0x102   :  { %p5026_p4 = por %p5025_p3, %p5024_p2 }
 0x104   :  { %p5027_p5 = pnand %p5026_p4, %p5020_p1 }
 0x106   :  { %5030 = shalt.err (!%p5027_p5)
}
 0x107   :  { %173 = dma.hbm_to_vmem [thread:$0]  %s6139_s17, 16, %s171_s12, [#allocation18]  }
 0x108   :  { %s5031_s8 = scalar_lea.hbm %s6142_s20, 16 }
 0x109   :  { %p5032_p6 = scmp.ne.s32.totalorder %s6142_s20, %s5031_s8  ;;  %p5035_p7 = scmp.lt.u32.totalorder %s5031_s8, %s6142_s20 }
 0x10b   :  { %p5037_p8 = pnand %p5035_p7, %p5032_p6 }
 0x10d   :  { %5040 = shalt.err (!%p5037_p8)
}
 0x10e   :  { %s5041_s27 = scalar_lea.vmem %s193_s28, 16  ;;  %s5045_s3 = scalar_lea.vmem %s193_s28, 32 }
 0x10f   :  { %p5042_p9 = scmp.ne.s32.totalorder %s193_s28, %s5041_s27  ;;  %p5046_p10 = scmp.lt.s32.totalorder %s193_s28, %s193_s28 }
 0x110   :  { %p5047_p11 = scmp.lt.s32.totalorder %s5045_s3, %s5041_s27 }
 0x112   :  { %p5048_p12 = por %p5047_p11, %p5046_p10 }
 0x114   :  { %p5049_p13 = pnand %p5048_p12, %p5042_p9 }
 0x116   :  { %5052 = shalt.err (!%p5049_p13)
}
 0x117   :  { %195 = dma.hbm_to_vmem [thread:$0]  %s6142_s20, 16, %s193_s28, [#allocation21]  }
 0x118   :  { %s5155_s11 = smov [#allocation25]   ;;  %s5156_s18 = smov [#allocation26]  }
 0x119   :  { %s214_s29 = sshll.u32 %s5155_s11, 4  ;;  %s224_s7 = sshll.u32 %s5156_s18, 4  ;;  %s215_s29 = int_to_ptr.vmem [resolvable:$true] %s214_s29  ;;  %s225_s7 = int_to_ptr.vmem [resolvable:$true] %s224_s7 }
 0x11a   :  { %s5053_s15 = scalar_lea.hbm %s6145_s23, 16 }
 0x11b   :  { %p5054_p0 = scmp.ne.s32.totalorder %s6145_s23, %s5053_s15  ;;  %p5057_p1 = scmp.lt.u32.totalorder %s5053_s15, %s6145_s23 }
 0x11d   :  { %p5059_p2 = pnand %p5057_p1, %p5054_p0 }
 0x11f   :  { %5062 = shalt.err (!%p5059_p2)
}
 0x120   :  { %s5063_s20 = scalar_lea.vmem %s215_s29, 16  ;;  %s5067_s28 = scalar_lea.vmem %s215_s29, 32 }
 0x121   :  { %p5064_p3 = scmp.ne.s32.totalorder %s215_s29, %s5063_s20  ;;  %p5068_p4 = scmp.lt.s32.totalorder %s215_s29, %s215_s29 }
 0x122   :  { %p5069_p5 = scmp.lt.s32.totalorder %s5067_s28, %s5063_s20 }
 0x124   :  { %p5070_p6 = por %p5069_p5, %p5068_p4 }
 0x126   :  { %p5071_p7 = pnand %p5070_p6, %p5064_p3 }
 0x128   :  { %5074 = shalt.err (!%p5071_p7)
}
 0x129   :  { %217 = dma.hbm_to_vmem [thread:$0]  %s6145_s23, 16, %s215_s29, [#allocation24]  }
 0x12a   :  { %s5075_s2 = scalar_lea.hbm %s6146_s24, 16 }
 0x12b   :  { %p5076_p8 = scmp.ne.s32.totalorder %s6146_s24, %s5075_s2  ;;  %p5079_p9 = scmp.lt.u32.totalorder %s5075_s2, %s6146_s24 }
 0x12d   :  { %p5081_p10 = pnand %p5079_p9, %p5076_p8 }
 0x12f   :  { %5084 = shalt.err (!%p5081_p10)
}
 0x130   :  { %s5085_s12 = scalar_lea.vmem %s225_s7, 16  ;;  %s5089_s11 = scalar_lea.vmem %s225_s7, 32 }
 0x131   :  { %p5086_p11 = scmp.ne.s32.totalorder %s225_s7, %s5085_s12  ;;  %p5090_p12 = scmp.lt.s32.totalorder %s225_s7, %s225_s7 }
 0x132   :  { %p5091_p13 = scmp.lt.s32.totalorder %s5089_s11, %s5085_s12 }
 0x134   :  { %p5092_p0 = por %p5091_p13, %p5090_p12 }
 0x136   :  { %p5093_p1 = pnand %p5092_p0, %p5086_p11 }
 0x138   :  { %5096 = shalt.err (!%p5093_p1)
}
 0x139   :  { %227 = dma.hbm_to_vmem [thread:$0]  %s6146_s24, 16, %s225_s7, [#allocation27]  }
 0x13a   :  { %5119 = dma.done.wait [#allocation3], 256  }
 0x13b   :  { %5120 = vsyncadd [#allocation3], 4294967040 }
 0x13c   :  { %5121 = dma.done.wait [#allocation6], 528  }
 0x13d   :  { %5122 = vsyncadd [#allocation6], 4294966768 }
 0x13e   :  { %5123 = dma.done.wait [#allocation9], 528  }
 0x13f   :  { %5124 = vsyncadd [#allocation9], 4294966768 }
 0x140   :  { %5125 = dma.done.wait [#allocation12], 528  }
 0x141   :  { %5126 = vsyncadd [#allocation12], 4294966768 }
 0x142   :  { %5127 = dma.done.wait [#allocation15], 32  }
 0x143   :  { %5128 = vsyncadd [#allocation15], 4294967264 }
 0x144   :  { %5129 = dma.done.wait [#allocation18], 32  }
 0x145   :  { %5130 = vsyncadd [#allocation18], 4294967264 }
 0x146   :  { %5131 = dma.done.wait [#allocation21], 32  }
 0x147   :  { %5132 = vsyncadd [#allocation21], 4294967264 }
 0x148   :  { %5133 = dma.done.wait [#allocation24], 32  }
 0x149   :  { %5134 = vsyncadd [#allocation24], 4294967264 }
 0x14a   :  { %5135 = dma.done.wait [#allocation27], 16  }
 0x14b   :  { %5136 = vsyncadd [#allocation27], 4294967280  ;;  %vm295_vm0 = vcmask 261120   ;;  %s6174_s7 = sld [smem:[#allocation44_spill]]  ;;  %s6175_s28 = sld [smem:[#allocation39_spill]]  ;;  %v5157_v10 = vmov 0.0  }
 0x14c   :  { %s6176_s2 = sld [smem:[#allocation45_spill]]  ;;  %4186 = vmatprep.subr.mxu0 %v5157_v10  ;;  %s5158_s6 = smov 112   ;;  %vm5160_vm1 = vmmov 0   ;;  %vm395_vm2 = vcmask 64512   ;;  %vm1740_vm3 = vcmask 130048   ;;  %vm1743_vm4 = vcmask 195584  }
 0x14d   :  { %s5159_s27 = smov 120   ;;  %4188 = vmatprep.mubr.msk.f32.mxu0 %vm5160_vm1, %v5157_v10  ;;  %s5161_s3 = smov 104   ;;  %vm5803_vm5 = vmpackc.low %vm395_vm2, %vm395_vm2  ;;  %vm3680_vm6 = vcmask 523264   ;;  %vm3677_vm7 = vcmask 392192  }
 0x14e   :  { %s5162_s17 = smov 96   ;;  %s6177_s23 = sld [smem:[#allocation41_spill]] }
 0x14f   :  { %s5163_s18 = smov 64   ;;  %s6178_s0 = sld [smem:[#allocation46_spill]] }
 0x150   :  { %s5165_s14 = smov 24   ;;  %s6179_s13 = sld [smem:[#allocation43_spill]] }
 0x151   :  { %v284_v0 = vld [vmem:[%s6174_s7] sm:$0xff]  ;;  %v285_v1 = vld [vmem:[%s6174_s7 + $0x8] sm:$0xff]  ;;  %v286_v2 = vld [vmem:[%s6174_s7 + $0x10] sm:$0xff]  ;;  %s6180_s11 = sld [smem:[#allocation40_spill]]  ;;  %s5169_s15 = smov 48  }
 0x152   :  { %v4445_v3 = vpack.c.bf16 %v285_v1, %v284_v0  ;;  %v287_v4 = vld [vmem:[%s6174_s7 + $0x18] sm:$0xff]  ;;  %v5539_v5 = vld [vmem:[%s6175_s28] sm:$0xff]  ;;  %v5546_v7 = vld [vmem:[%s6175_s28 + $0x8] sm:$0xff]  ;;  %s5164_s28 = smov 16  }
 0x153   :  { %v4449_v6 = vpack.c.bf16 %v287_v4, %v286_v2  ;;  %4173 = vmatprep.mubr.msk.f32.mxu1 %vm295_vm0, %v5539_v5  ;;  %v3952_v8 = vld [vmem:[%s6176_s2] ss:$0 sm:$0xff] }
 0x154   :  { %4446 = vmatprep.subr.bf16.mxu1 %v4445_v3  ;;  %v391_v29 = vld [vmem:[%s6177_s23] sm:$0xff]  ;;  %v392_v34 = vld [vmem:[%s6177_s23 + $0x8] sm:$0xff] }
 0x155   :  { %4448 = vmatpush3.bf16.msra.mxu1 %v4445_v3 }
 0x156   :  { %4450 = vmatprep.subr.bf16.mxu1 %v4449_v6 }
 0x159   :  { %4452 = vmatpush3.bf16.msra.mxu1 %v4449_v6 }
 0x15a   :  { %4176 = vmatprep.subr.mxu1 %v5157_v10 }
 0x15c   :  { %4174 = vmatmul.mubr.msk.f32.vlgmr.msra.gmra.mrb[0].mxu1 %vm295_vm0, %v5546_v7 }
 0x15d   :  { %4178 = vmatprep.mubr.msk.f32.mxu1 %vm5160_vm1, %v5157_v10 }
 0x22f   :  { %v4175_v9 = vpop.f32.mrb[0].mxu1 }
 0x230   :  { %v368_v11 = vpop.f32.mrb[1].mxu1  ;;  %v5565_v13 = vadd.f32 %v4175_v9, %v3952_v8 }
 0x231   :  { %v5555_v12 = vadd.f32 %v3952_v8, %v368_v11 }
 0x233   :  { %383 = vrot.lane.b32.xlu1 %v5555_v12, %s5158_s6  ;;  %379 = vrot.lane.b32.xlu0 %v5555_v12, %s5159_s27 }
 0x237   :  { %385 = vrot.lane.b32.xlu1 %v5565_v13, %s5158_s6  ;;  %381 = vrot.lane.b32.xlu0 %v5565_v13, %s5159_s27 }
 0x23b   :  { %389 = vrot.lane.b32.xlu1 %v5565_v13, %s5161_s3  ;;  %387 = vrot.lane.b32.xlu0 %v5555_v12, %s5161_s3 }
 0x23f   :  { %470 = vrot.lane.b32.xlu1 %v5565_v13, %s5162_s17  ;;  %393 = vrot.lane.b32.xlu0 %v5555_v12, %s5162_s17 }
 0x2a5   :  { %v5579_v14 = vpop.permute.xlu1 %383  ;;  %v5581_v15 = vpop.permute.xlu0 %379 }
 0x2a6   :  { %546 = vrot.lane.b32.xlu0 %v5581_v15, %s5162_s17 }
 0x2a9   :  { %v5585_v16 = vpop.permute.xlu1 %385  ;;  %v5587_v17 = vpop.permute.xlu0 %381 }
 0x2aa   :  { %698 = vrot.lane.b32.xlu0 %v5579_v14, %s5162_s17  ;;  %622 = vrot.lane.b32.xlu1 %v5587_v17, %s5162_s17 }
 0x2ad   :  { %v5593_v18 = vpop.permute.xlu0 %387  ;;  %v5599_v19 = vpop.permute.xlu1 %389 }
 0x2ae   :  { %774 = vrot.lane.b32.xlu1 %v5585_v16, %s5162_s17  ;;  %850 = vrot.lane.b32.xlu0 %v5593_v18, %s5162_s17 }
 0x2b1   :  { %v394_v20 = vpop.permute.xlu0 %393  ;;  %v471_v21 = vpop.permute.xlu1 %470 }
 0x2b2   :  { %926 = vrot.lane.b32.xlu1 %v5599_v19, %s5162_s17  ;;  %4177 = vmatpush3.xpose.msk.msra.mxu1 %vm395_vm2, %v394_v20 }
 0x2b3   :  { %4181 = vmatprep.subr.mxu1 %v5157_v10 }
 0x2b5   :  { %4179 = vmatmul.mubr.msk.f32.vlgmr.msra.gmra.mrb[2].mxu1 %vm395_vm2, %v5555_v12 }
 0x2b6   :  { %4182 = vmatpush3.xpose.msk.msra.mxu1 %vm395_vm2, %v471_v21  ;;  %4183 = vmatprep.mubr.msk.f32.mxu1 %vm5160_vm1, %v5157_v10 }
 0x2b7   :  { %4191 = vmatprep.subr.mxu1 %v5157_v10 }
 0x2b9   :  { %4184 = vmatmul.mubr.msk.f32.vlgmr.msra.gmra.mrb[4].mxu1 %vm395_vm2, %v5565_v13 }
 0x2ba   :  { %4193 = vmatprep.mubr.msk.f32.mxu1 %vm5160_vm1, %v5157_v10 }
 0x318   :  { %v547_v22 = vpop.permute.xlu0 %546 }
 0x319   :  { %4187 = vmatpush3.xpose.msk.msra.mxu0 %vm395_vm2, %v547_v22 }
 0x31a   :  { %4196 = vmatprep.subr.mxu0 %v5157_v10 }
 0x31c   :  { %v623_v23 = vpop.permute.xlu1 %622  ;;  %4189 = vmatmul.mubr.msk.f32.vlgmr.msra.gmra.mrb[0].mxu0 %vm395_vm2, %v5581_v15  ;;  %v699_v24 = vpop.permute.xlu0 %698 }
 0x31d   :  { %4192 = vmatpush3.xpose.msk.msra.mxu1 %vm395_vm2, %v623_v23  ;;  %4197 = vmatpush3.xpose.msk.msra.mxu0 %vm395_vm2, %v699_v24 }
 0x31e   :  { %4198 = vmatprep.mubr.msk.f32.mxu0 %vm5160_vm1, %v5157_v10  ;;  %4201 = vmatprep.subr.mxu1 %v5157_v10 }
 0x31f   :  { %4206 = vmatprep.subr.mxu0 %v5157_v10 }
 0x320   :  { %v775_v25 = vpop.permute.xlu1 %774  ;;  %4194 = vmatmul.mubr.msk.f32.vlgmr.msra.gmra.mrb[6].mxu1 %vm395_vm2, %v5587_v17  ;;  %4199 = vmatmul.mubr.msk.f32.vlgmr.msra.gmra.mrb[2].mxu0 %vm395_vm2, %v5579_v14  ;;  %v851_v26 = vpop.permute.xlu0 %850 }
 0x321   :  { %4202 = vmatpush3.xpose.msk.msra.mxu1 %vm395_vm2, %v775_v25  ;;  %4207 = vmatpush3.xpose.msk.msra.mxu0 %vm395_vm2, %v851_v26 }
 0x322   :  { %4203 = vmatprep.mubr.msk.f32.mxu1 %vm5160_vm1, %v5157_v10  ;;  %4208 = vmatprep.mubr.msk.f32.mxu0 %vm5160_vm1, %v5157_v10 }
 0x323   :  { %4211 = vmatprep.subr.mxu1 %v5157_v10  ;;  %4216 = vmatprep.subr.mxu0 %v5157_v10 }
 0x324   :  { %v927_v27 = vpop.permute.xlu1 %926  ;;  %4204 = vmatmul.mubr.msk.f32.vlgmr.msra.gmra.mrb[8].mxu1 %vm395_vm2, %v5585_v16  ;;  %4209 = vmatmul.mubr.msk.f32.vlgmr.msra.gmra.mrb[4].mxu0 %vm395_vm2, %v5593_v18 }
 0x325   :  { %4212 = vmatpush3.xpose.msk.msra.mxu1 %vm395_vm2, %v927_v27  ;;  %4213 = vmatprep.mubr.msk.f32.mxu1 %vm5160_vm1, %v5157_v10 }
 0x326   :  { %4221 = vmatprep.subr.mxu1 %v5157_v10  ;;  %4218 = vmatprep.mubr.msk.f32.mxu0 %vm5160_vm1, %v5157_v10 }
 0x328   :  { %4214 = vmatmul.mubr.msk.f32.vlgmr.msra.gmra.mrb[10].mxu1 %vm395_vm2, %v5599_v19 }
 0x329   :  { %4223 = vmatprep.mubr.msk.f32.mxu1 %vm5160_vm1, %v5157_v10 }
 0x388   :  { %v466_v28 = vpop.f32.mrb[2].mxu1 }
 0x389   :  { %v1002_v30 = vmul.f32 0.35355338, %v466_v28  ;;  %v4180_v31 = vpop.f32.mrb[3].mxu1 }
 0x38b   :  { %v1010_v32 = vadd.f32 %v1002_v30, %v391_v29 }
 0x38c   :  { %v542_v33 = vpop.f32.mrb[4].mxu1 }
 0x38d   :  { %v1003_v35 = vmul.f32 0.35355338, %v542_v33  ;;  %v4185_v36 = vpop.f32.mrb[5].mxu1  ;;  %v1018_v37 = vsel %vm395_vm2, %v1010_v32, -inf }
 0x38e   :  { %1019 = vmax.xlane.f32.xlu0 %v1018_v37 }
 0x38f   :  { %v1011_v38 = vadd.f32 %v1003_v35, %v392_v34 }
 0x391   :  { %v1021_v39 = vsel %vm395_vm2, %v1011_v38, -inf }
 0x392   :  { %1022 = vmax.xlane.f32.xlu1 %v1021_v39 }
 0x3ef   :  { %v618_v40 = vpop.f32.mrb[0].mxu0 }
 0x3f0   :  { %v1004_v41 = vmul.f32 0.35355338, %v618_v40  ;;  %v4190_v42 = vpop.f32.mrb[1].mxu0 }
 0x3f2   :  { %v1012_v43 = vadd.f32 %v1004_v41, %v391_v29 }
 0x3f3   :  { %v694_v44 = vpop.f32.mrb[6].mxu1  ;;  %v770_v45 = vpop.f32.mrb[2].mxu0 }
 0x3f4   :  { %v1005_v46 = vmul.f32 0.35355338, %v694_v44  ;;  %v1006_v47 = vmul.f32 0.35355338, %v770_v45  ;;  %v4195_v48 = vpop.f32.mrb[7].mxu1  ;;  %v4200_v49 = vpop.f32.mrb[3].mxu0 }
 0x3f5   :  { %v1024_v50 = vsel %vm395_vm2, %v1012_v43, -inf }
 0x3f6   :  { %1025 = vmax.xlane.f32.xlu0 %v1024_v50  ;;  %v1013_v51 = vadd.f32 %v1005_v46, %v392_v34  ;;  %v1014_v52 = vadd.f32 %v1006_v47, %v391_v29 }
 0x3f7   :  { %v846_v53 = vpop.f32.mrb[8].mxu1  ;;  %v922_v54 = vpop.f32.mrb[4].mxu0 }
 0x3f8   :  { %v1007_v55 = vmul.f32 0.35355338, %v846_v53  ;;  %v1008_v56 = vmul.f32 0.35355338, %v922_v54  ;;  %v4205_v57 = vpop.f32.mrb[9].mxu1  ;;  %v4210_v58 = vpop.f32.mrb[5].mxu0 }
 0x3f9   :  { %v1027_v59 = vsel %vm395_vm2, %v1013_v51, -inf  ;;  %v1030_v60 = vsel %vm395_vm2, %v1014_v52, -inf }
 0x3fa   :  { %1028 = vmax.xlane.f32.xlu0 %v1027_v59  ;;  %1031 = vmax.xlane.f32.xlu1 %v1030_v60  ;;  %v1015_v61 = vadd.f32 %v1007_v55, %v392_v34  ;;  %v1016_v62 = vadd.f32 %v1008_v56, %v391_v29 }
 0x3fb   :  { %v998_v63 = vpop.f32.mrb[10].mxu1 }
 0x3fc   :  { %v1009_v0 = vmul.f32 0.35355338, %v998_v63  ;;  %v4215_v1 = vpop.f32.mrb[11].mxu1  ;;  %v1033_v2 = vsel %vm395_vm2, %v1015_v61, -inf  ;;  %v1036_v3 = vsel %vm395_vm2, %v1016_v62, -inf }
 0x3fe   :  { %1034 = vmax.xlane.f32.xlu0 %v1033_v2  ;;  %1037 = vmax.xlane.f32.xlu1 %v1036_v3  ;;  %v1017_v4 = vadd.f32 %v1009_v0, %v392_v34 }
 0x400   :  { %v1039_v6 = vsel %vm395_vm2, %v1017_v4, -inf }
 0x402   :  { %1040 = vmax.xlane.f32.xlu0 %v1039_v6 }
 0x40f   :  { %1106 = vrot.lane.b32.xlu1 %v5555_v12, %s5163_s18 }
 0x413   :  { %1258 = vrot.lane.b32.xlu1 %v5581_v15, %s5163_s18 }
 0x417   :  { %1334 = vrot.lane.b32.xlu1 %v5587_v17, %s5163_s18 }
 0x418   :  { %1182 = vrot.lane.b32.xlu0 %v5565_v13, %s5163_s18 }
 0x41b   :  { %1486 = vrot.lane.b32.xlu1 %v5585_v16, %s5163_s18  ;;  %v1020_v11 = vpop.xlane.xlu0 %1019 }
 0x41c   :  { %1410 = vrot.lane.b32.xlu0 %v5579_v14, %s5163_s18  ;;  %v1042_v20 = vsub.f32 %v1010_v32, %v1020_v11 }
 0x41e   :  { %v1050_v21 = vmul.f32 1.442695, %v1042_v20 }
 0x41f   :  { %v1023_v8 = vpop.xlane.xlu1 %1022 }
 0x420   :  { %v1043_v9 = vsub.f32 %v1011_v38, %v1023_v8 }
 0x422   :  { %v1052_v12 = vmul.f32 1.442695, %v1043_v9 }
 0x424   :  { %4669 = vpow2.f32 %v1052_v12 }
 0x425   :  { %4671 = vpow2.f32 %v1050_v21 }
 0x42e   :  { %v5677_v15 = vpop.eup %4669 }
 0x42f   :  { %v1069_v17 = vsel %vm395_vm2, %v5677_v15, 0.0  ;;  %v5681_v13 = vpop.eup %4671 }
 0x430   :  { %v1066_v16 = vsel %vm395_vm2, %v5681_v13, 0.0 }
 0x43b   :  { %1070 = vadd.xlane.f32.xlu0 %v1069_v17 }
 0x43f   :  { %1067 = vadd.xlane.f32.xlu1 %v1066_v16 }
 0x483   :  { %v1026_v14 = vpop.xlane.xlu0 %1025 }
 0x484   :  { %v1044_v22 = vsub.f32 %v1012_v43, %v1026_v14 }
 0x486   :  { %v1054_v23 = vmul.f32 1.442695, %v1044_v22 }
 0x487   :  { %v1032_v24 = vpop.xlane.xlu1 %1031  ;;  %v1029_v25 = vpop.xlane.xlu0 %1028 }
 0x488   :  { %4673 = vpow2.f32 %v1054_v23  ;;  %v1046_v26 = vsub.f32 %v1014_v52, %v1032_v24  ;;  %v1045_v27 = vsub.f32 %v1013_v51, %v1029_v25 }
 0x48a   :  { %v1058_v28 = vmul.f32 1.442695, %v1046_v26  ;;  %v1056_v29 = vmul.f32 1.442695, %v1045_v27  ;;  %v1746_v26 = vld [vmem:[%s6178_s0] sm:$0xff]  ;;  %v1747_v27 = vld [vmem:[%s6178_s0 + $0x8] sm:$0xff] }
 0x48b   :  { %v1038_v30 = vpop.xlane.xlu1 %1037  ;;  %v1035_v31 = vpop.xlane.xlu0 %1034 }
 0x48c   :  { %4675 = vpow2.f32 %v1058_v28  ;;  %v1048_v32 = vsub.f32 %v1016_v62, %v1038_v30  ;;  %v1047_v33 = vsub.f32 %v1015_v61, %v1035_v31  ;;  %v4453_v28 = vpack.c.bf16 %v1747_v27, %v1746_v26  ;;  %v1749_v30 = vld [vmem:[%s6178_s0 + $0x18] sm:$0xff]  ;;  %v283_v26 = vld [vmem:[%s6179_s13 + $0x8] sm:$0xff] }
 0x48d   :  { %4677 = vpow2.f32 %v1056_v29  ;;  %v1748_v29 = vld [vmem:[%s6178_s0 + $0x10] sm:$0xff] }
 0x48e   :  { %v1062_v34 = vmul.f32 1.442695, %v1048_v32  ;;  %v1060_v35 = vmul.f32 1.442695, %v1047_v33  ;;  %v4457_v31 = vpack.c.bf16 %v1749_v30, %v1748_v29  ;;  %v1900_v29 = vld [vmem:[#allocation7 + $0x18] sm:$0xff] }
 0x48f   :  { %v1107_v36 = vpop.permute.xlu1 %1106  ;;  %v1041_v37 = vpop.xlane.xlu0 %1040 }
 0x490   :  { %4679 = vpow2.f32 %v1062_v34  ;;  %v1049_v38 = vsub.f32 %v1017_v4, %v1041_v37  ;;  %4217 = vmatpush3.msra.mxu0 %v1107_v36 }
 0x491   :  { %4681 = vpow2.f32 %v1060_v35  ;;  %4226 = vmatprep.subr.mxu0 %v5157_v10 }
 0x492   :  { %v4674_v39 = vpop.eup %4673  ;;  %v1064_v40 = vmul.f32 1.442695, %v1049_v38 }
 0x493   :  { %v1183_v41 = vpop.permute.xlu0 %1182  ;;  %v1072_v42 = vsel %vm395_vm2, %v4674_v39, 0.0  ;;  %v1259_v53 = vpop.permute.xlu1 %1258 }
 0x494   :  { %4683 = vpow2.f32 %v1064_v40  ;;  %1073 = vadd.xlane.f32.xlu1 %v1072_v42  ;;  %4222 = vmatpush3.msra.mxu1 %v1183_v41 }
 0x495   :  { %4231 = vmatprep.subr.mxu1 %v5157_v10 }
 0x496   :  { %v4676_v43 = vpop.eup %4675 }
 0x497   :  { %v4678_v44 = vpop.eup %4677  ;;  %v1078_v45 = vsel %vm395_vm2, %v4676_v43, 0.0  ;;  %v1335_v54 = vpop.permute.xlu1 %1334 }
 0x498   :  { %1079 = vadd.xlane.f32.xlu1 %v1078_v45  ;;  %v1075_v46 = vsel %vm395_vm2, %v4678_v44, 0.0  ;;  %v1411_v55 = vpop.permute.xlu0 %1410 }
 0x499   :  { %1076 = vadd.xlane.f32.xlu0 %v1075_v46 }
 0x49a   :  { %v4680_v47 = vpop.eup %4679 }
 0x49b   :  { %v4682_v48 = vpop.eup %4681  ;;  %v1084_v49 = vsel %vm395_vm2, %v4680_v47, 0.0  ;;  %v1487_v56 = vpop.permute.xlu1 %1486 }
 0x49c   :  { %1085 = vadd.xlane.f32.xlu1 %v1084_v49  ;;  %v1081_v50 = vsel %vm395_vm2, %v4682_v48, 0.0 }
 0x49d   :  { %1082 = vadd.xlane.f32.xlu0 %v1081_v50 }
 0x49e   :  { %v5692_v51 = vpop.eup %4683 }
 0x49f   :  { %v1087_v52 = vsel %vm395_vm2, %v5692_v51, 0.0 }
 0x4a1   :  { %1088 = vadd.xlane.f32.xlu0 %v1087_v52 }
 0x4ad   :  { %1638 = vrot.lane.b32.xlu1 %v5599_v19, %s5163_s18 }
 0x4b7   :  { %1562 = vrot.lane.b32.xlu0 %v5593_v18, %s5163_s18 }
 0x4c8   :  { %v1071_v57 = vpop.xlane.xlu0 %1070 }
 0x4c9   :  { %4685 = vrcp.f32 %v1071_v57 }
 0x4cc   :  { %v1068_v58 = vpop.xlane.xlu1 %1067 }
 0x4cd   :  { %4687 = vrcp.f32 %v1068_v58 }
 0x4d3   :  { %v4686_v59 = vpop.eup %4685 }
 0x4d4   :  { %v1099_v60 = vmul.f32 %v4686_v59, %v5677_v15 }
 0x4d6   :  { %4224 = vmatmul.mubr.msk.f32.vlgmr.msra.gmra.mrb[12].mxu1 %vm395_vm2, %v1099_v60 }
 0x4d7   :  { %v4688_v61 = vpop.eup %4687  ;;  %4232 = vmatpush3.msra.mxu1 %v1335_v54  ;;  %4233 = vmatprep.mubr.msk.f32.mxu1 %vm5160_vm1, %v5157_v10 }
 0x4d8   :  { %v1098_v18 = vmul.f32 %v4688_v61, %v5681_v13  ;;  %4241 = vmatprep.subr.mxu1 %v5157_v10 }
 0x4da   :  { %4219 = vmatmul.mubr.msk.f32.vlgmr.msra.gmra.mrb[6].mxu0 %vm395_vm2, %v1098_v18 }
 0x4db   :  { %4227 = vmatpush3.msra.mxu0 %v1259_v53  ;;  %4228 = vmatprep.mubr.msk.f32.mxu0 %vm5160_vm1, %v5157_v10 }
 0x4dc   :  { %4236 = vmatprep.subr.mxu0 %v5157_v10 }
 0x521   :  { %v1074_v19 = vpop.xlane.xlu1 %1073 }
 0x522   :  { %4689 = vrcp.f32 %v1074_v19 }
 0x525   :  { %v1080_v62 = vpop.xlane.xlu1 %1079 }
 0x526   :  { %4691 = vrcp.f32 %v1080_v62  ;;  %v1077_v63 = vpop.xlane.xlu0 %1076 }
 0x527   :  { %4693 = vrcp.f32 %v1077_v63  ;;  %v5166_v63 = vmov 0  }
 0x528   :  { %4598 = vset.pattern.permute.xlu0 %v5166_v63  ;;  %4597 = vset.pattern.permute.xlu1 %v5166_v63 }
 0x529   :  { %v1086_v0 = vpop.xlane.xlu1 %1085 }
 0x52a   :  { %4695 = vrcp.f32 %v1086_v0  ;;  %v1083_v1 = vpop.xlane.xlu0 %1082  ;;  %v282_v0 = vld [vmem:[%s6179_s13] sm:$0xff] }
 0x52b   :  { %4697 = vrcp.f32 %v1083_v1  ;;  %v1989_v1 = vld [vmem:[#allocation10] sm:$0xff] }
 0x52c   :  { %v4690_v2 = vpop.eup %4689 }
 0x52d   :  { %v1100_v3 = vmul.f32 %v4690_v2, %v4674_v39  ;;  %v1639_v13 = vpop.permute.xlu1 %1638  ;;  %v1990_v2 = vld [vmem:[#allocation10 + $0x8] sm:$0xff] }
 0x52e   :  { %v1089_v4 = vpop.xlane.xlu0 %1088 }
 0x52f   :  { %4699 = vrcp.f32 %v1089_v4  ;;  %4229 = vmatmul.mubr.msk.f32.vlgmr.msra.gmra.mrb[8].mxu0 %vm395_vm2, %v1100_v3  ;;  %v4469_v3 = vpack.c.bf16 %v1990_v2, %v1989_v1  ;;  %v1992_v4 = vld [vmem:[#allocation10 + $0x18] sm:$0xff] }
 0x530   :  { %v4692_v6 = vpop.eup %4691  ;;  %4237 = vmatpush3.msra.mxu0 %v1411_v55  ;;  %4238 = vmatprep.mubr.msk.f32.mxu0 %vm5160_vm1, %v5157_v10 }
 0x531   :  { %v4694_v8 = vpop.eup %4693  ;;  %v1102_v9 = vmul.f32 %v4692_v6, %v4676_v43  ;;  %4246 = vmatprep.subr.mxu0 %v5157_v10 }
 0x532   :  { %v1101_v11 = vmul.f32 %v4694_v8, %v4678_v44  ;;  %v1563_v20 = vpop.permute.xlu0 %1562 }
 0x533   :  { %4239 = vmatmul.mubr.msk.f32.vlgmr.msra.gmra.mrb[10].mxu0 %vm395_vm2, %v1102_v9 }
 0x534   :  { %v4696_v12 = vpop.eup %4695  ;;  %4234 = vmatmul.mubr.msk.f32.vlgmr.msra.gmra.mrb[14].mxu1 %vm395_vm2, %v1101_v11  ;;  %4247 = vmatpush3.msra.mxu0 %v1563_v20 }
 0x535   :  { %v4698_v21 = vpop.eup %4697  ;;  %v1104_v15 = vmul.f32 %v4696_v12, %v4680_v47  ;;  %4242 = vmatpush3.msra.mxu1 %v1487_v56  ;;  %4243 = vmatprep.mubr.msk.f32.mxu1 %vm5160_vm1, %v5157_v10  ;;  %v3979_v56 = vld [vmem:[#allocation5] ss:$0 sm:$0xff] }
 0x536   :  { %v1103_v17 = vmul.f32 %v4698_v21, %v4682_v48  ;;  %4248 = vmatprep.mubr.msk.f32.mxu0 %vm5160_vm1, %v5157_v10  ;;  %4251 = vmatprep.subr.mxu1 %v5157_v10 }
 0x537   :  { %4249 = vmatmul.mubr.msk.f32.vlgmr.msra.gmra.mrb[12].mxu0 %vm395_vm2, %v1104_v15  ;;  %4454 = vmatprep.subr.bf16.mxu0 %v4453_v28 }
 0x538   :  { %4244 = vmatmul.mubr.msk.f32.vlgmr.msra.gmra.mrb[16].mxu1 %vm395_vm2, %v1103_v17  ;;  %4456 = vmatpush3.bf16.msra.mxu0 %v4453_v28  ;;  %v1899_v28 = vld [vmem:[#allocation7 + $0x10] sm:$0xff] }
 0x539   :  { %v4700_v16 = vpop.eup %4699  ;;  %4252 = vmatpush3.msra.mxu1 %v1639_v13  ;;  %4253 = vmatprep.mubr.msk.f32.mxu1 %vm5160_vm1, %v5157_v10  ;;  %v4465_v30 = vpack.c.bf16 %v1900_v29, %v1899_v28 }
 0x53a   :  { %v1105_v14 = vmul.f32 %v4700_v16, %v5692_v51  ;;  %4458 = vmatprep.subr.bf16.mxu0 %v4457_v31  ;;  %v278_v16 = vld [vmem:[%s6180_s11] sm:$0xff] }
 0x53c   :  { %4254 = vmatmul.mubr.msk.f32.vlgmr.msra.gmra.mrb[18].mxu1 %vm395_vm2, %v1105_v14  ;;  %4460 = vmatpush3.bf16.msra.mxu0 %v4457_v31  ;;  %v279_v14 = vld [vmem:[%s6180_s11 + $0x8] sm:$0xff]  ;;  %v5167_v31 = vmov 0.0|0.0  }
 0x53d   :  { %4470 = vmatprep.subr.bf16.mxu0 %v4469_v3 }
 0x5a9   :  { %v1254_v22 = vpop.f32.mrb[12].mxu1 }
 0x5aa   :  { %v4225_v23 = vpop.f32.mrb[13].mxu1 }
 0x5ab   :  { %v281_v23 = vld [vmem:[%s6180_s11 + $0x18] sm:$0xff] }
 0x5ad   :  { %v1178_v24 = vpop.f32.mrb[6].mxu0 }
 0x5ae   :  { %v4220_v25 = vpop.f32.mrb[7].mxu0 }
 0x5af   :  { %v1898_v25 = vld [vmem:[#allocation7 + $0x8] sm:$0xff] }
 0x602   :  { %v1330_v32 = vpop.f32.mrb[8].mxu0 }
 0x603   :  { %v4230_v33 = vpop.f32.mrb[9].mxu0  ;;  %1716 = vrot.lane.b32.xlu0 %v1330_v32, %s5148_s5 }
 0x606   :  { %v1482_v34 = vpop.f32.mrb[10].mxu0 }
 0x607   :  { %v1406_v35 = vpop.f32.mrb[14].mxu1  ;;  %1724 = vrot.lane.b32.xlu0 %v1482_v34, %s5164_s28  ;;  %v4240_v36 = vpop.f32.mrb[11].mxu0 }
 0x608   :  { %1718 = vrot.lane.b32.xlu1 %v1406_v35, %s5148_s5  ;;  %v4235_v37 = vpop.f32.mrb[15].mxu1 }
 0x60a   :  { %v1634_v38 = vpop.f32.mrb[12].mxu0 }
 0x60b   :  { %v1558_v39 = vpop.f32.mrb[16].mxu1  ;;  %1732 = vrot.lane.b32.xlu0 %v1634_v38, %s5165_s14  ;;  %v4250_v40 = vpop.f32.mrb[13].mxu0 }
 0x60c   :  { %1726 = vrot.lane.b32.xlu1 %v1558_v39, %s5164_s28  ;;  %v4245_v41 = vpop.f32.mrb[17].mxu1  ;;  %v3982_v39 = vld [vmem:[#allocation16] ss:$0 sm:$0xff] }
 0x60f   :  { %v1710_v42 = vpop.f32.mrb[18].mxu1 }
 0x610   :  { %1734 = vrot.lane.b32.xlu1 %v1710_v42, %s5165_s14  ;;  %v4255_v43 = vpop.f32.mrb[19].mxu1 }
 0x611   :  { %v3983_v43 = vld [vmem:[#allocation17] ss:$0 sm:$0xff] }
 0x675   :  { %v1717_v44 = vpop.permute.xlu0 %1716 }
 0x676   :  { %v1738_v47 = vsel %vm395_vm2, %v1178_v24, %v1717_v44  ;;  %v1897_v24 = vld [vmem:[#allocation7] sm:$0xff] }
 0x677   :  { %v4461_v27 = vpack.c.bf16 %v1898_v25, %v1897_v24 }
 0x679   :  { %v1725_v45 = vpop.permute.xlu0 %1724  ;;  %4462 = vmatprep.subr.bf16.mxu1 %v4461_v27 }
 0x67a   :  { %v1719_v46 = vpop.permute.xlu1 %1718  ;;  %v1741_v48 = vsel %vm1740_vm3, %v1738_v47, %v1725_v45  ;;  %4464 = vmatpush3.bf16.msra.mxu1 %v4461_v27 }
 0x67b   :  { %v1739_v52 = vsel %vm395_vm2, %v1254_v22, %v1719_v46  ;;  %v280_v22 = vld [vmem:[%s6180_s11 + $0x10] sm:$0xff]  ;;  %4466 = vmatprep.subr.bf16.mxu1 %v4465_v30 }
 0x67d   :  { %v1733_v49 = vpop.permute.xlu0 %1732 }
 0x67e   :  { %v1727_v50 = vpop.permute.xlu1 %1726  ;;  %v1744_v51 = vsel %vm1743_vm4, %v1741_v48, %v1733_v49  ;;  %4468 = vmatpush3.bf16.msra.mxu1 %v4465_v30 }
 0x67f   :  { %4264 = vmatprep.mubr.msk.f32.mxu0 %vm295_vm0, %v1744_v51  ;;  %v1742_v53 = vsel %vm1740_vm3, %v1739_v52, %v1727_v50  ;;  %4477 = vmatprep.subr.bf16.mxu1 %v5167_v31  ;;  %v3987_v52 = vld [vmem:[#allocation11] ss:$0 sm:$0xff] }
 0x682   :  { %v1735_v54 = vpop.permute.xlu1 %1734 }
 0x683   :  { %v1745_v55 = vsel %vm1743_vm4, %v1742_v53, %v1735_v54 }
 0x684   :  { %4265 = vmatmul.mubr.msk.f32.vlgmr.msra.gmra.mrb[14].mxu0 %vm295_vm0, %v1745_v55 }
 0x685   :  { %4472 = vmatpush3.bf16.msra.mxu0 %v4469_v3  ;;  %4286 = vmatprep.mubr.msk.f32.mxu0 %vm295_vm0, %v278_v16 }
 0x757   :  { %v4266_v57 = vpop.f32.mrb[14].mxu0 }
 0x758   :  { %v1835_v58 = vadd.f32 %v4266_v57, %v3979_v56  ;;  %v1829_v59 = vpop.f32.mrb[15].mxu0 }
 0x759   :  { %v1830_v60 = vadd.f32 %v3979_v56, %v1829_v59 }
 0x75a   :  { %v1841_v61 = vadd.f32 %v1835_v58, %v5546_v7  ;;  %v1991_v7 = vld [vmem:[#allocation10 + $0x10] sm:$0xff] }
 0x75b   :  { %v1840_v18 = vadd.f32 %v1830_v60, %v5539_v5  ;;  %v4473_v5 = vpack.c.bf16 %v1992_v4, %v1991_v7 }
 0x75c   :  { %v1845_v19 = vsel %vm295_vm0, %v1841_v61, 0.0 }
 0x75d   :  { %1846 = vadd.xlane.f32.xlu1 %v1845_v19  ;;  %v1842_v62 = vsel %vm295_vm0, %v1840_v18, 0.0  ;;  %4474 = vmatprep.subr.bf16.mxu0 %v4473_v5 }
 0x75e   :  { %1843 = vadd.xlane.f32.xlu0 %v1842_v62  ;;  %4476 = vmatpush3.bf16.msra.mxu0 %v4473_v5 }
 0x75f   :  { %4481 = vmatprep.subr.bf16.mxu0 %v5167_v31 }
 0x761   :  { %4287 = vmatmul.mubr.msk.f32.vlgmr.msra.gmra.mrb[16].mxu0 %vm295_vm0, %v279_v14 }
 0x762   :  { %4289 = vmatprep.mubr.msk.f32.mxu0 %vm295_vm0, %v280_v22 }
 0x765   :  { %4290 = vmatmul.mubr.msk.f32.gmra.mrb[18].mxu0 %vm295_vm0, %v281_v23 }
 0x766   :  { %4303 = vmatprep.mubr.msk.f32.mxu0 %vm5160_vm1, %v5157_v10 }
 0x76e   :  { %1887 = vperm.xlu1 %4597, %v282_v0  }
 0x7ea   :  { %v1847_v6 = vpop.xlane.xlu1 %1846 }
 0x7eb   :  { %v1850_v8 = vmul.f32 0.03125, %v1847_v6  ;;  %v1844_v9 = vpop.xlane.xlu0 %1843 }
 0x7ec   :  { %v1849_v11 = vmul.f32 0.03125, %v1844_v9 }
 0x7ed   :  { %v1852_v20 = vsub.f32 %v1841_v61, %v1850_v8 }
 0x7ee   :  { %v1851_v12 = vsub.f32 %v1840_v18, %v1849_v11  ;;  %v5785_v47 = vpop.permute.xlu1 %1887 }
 0x7ef   :  { %v1854_v21 = vmul.f32 %v1852_v20, %v1852_v20 }
 0x7f0   :  { %v1853_v17 = vmul.f32 %v1851_v12, %v1851_v12 }
 0x7f1   :  { %v1858_v15 = vsel %vm295_vm0, %v1854_v21, 0.0 }
 0x7f2   :  { %1859 = vadd.xlane.f32.xlu0 %v1858_v15  ;;  %v1855_v13 = vsel %vm295_vm0, %v1853_v17, 0.0 }
 0x7f6   :  { %1856 = vadd.xlane.f32.xlu0 %v1855_v13 }
 0x80c   :  { %1892 = vperm.xlu0 %4598, %v283_v26  }
 0x834   :  { %v4288_v53 = vpop.f32.mrb[16].mxu0 }
 0x835   :  { %v2084_v54 = vadd.f32 %v4288_v53, %v3987_v52  ;;  %v2078_v55 = vpop.f32.mrb[17].mxu0 }
 0x836   :  { %v2079_v56 = vadd.f32 %v3987_v52, %v2078_v55 }
 0x838   :  { %v4291_v58 = vpop.f32.mrb[18].mxu0  ;;  %v5807_v59 = vpack.i.bf16 %v2084_v54, %v2079_v56  ;;  %v4478_v60 = vpack.c.bf16 %v2084_v54, %v2079_v56 }
 0x839   :  { %v2094_v61 = vadd.f32 %v4291_v58, %v3987_v52  ;;  %v2088_v18 = vpop.f32.mrb[19].mxu0 }
 0x83a   :  { %v2089_v19 = vadd.f32 %v3987_v52, %v2088_v18  ;;  %4600 = vrot.lane.b32.xlu1 %v5807_v59, %s5159_s27 }
 0x83c   :  { %v5814_v62 = vpack.i.bf16 %v2094_v61, %v2089_v19  ;;  %v4482_v63 = vpack.c.bf16 %v2094_v61, %v2089_v19 }
 0x83e   :  { %4605 = vrot.lane.b32.xlu1 %v5814_v62, %s5159_s27  ;;  %4484 = vmatpush3.bf16.xpose.msk.msra.mxu0 %vm5803_vm5, %v4482_v63 }
 0x83f   :  { %4489 = vmatprep.subr.bf16.mxu0 %v5167_v31 }
 0x842   :  { %4610 = vrot.lane.b32.xlu1 %v5807_v59, %s5158_s6 }
 0x846   :  { %4615 = vrot.lane.b32.xlu1 %v5814_v62, %s5158_s6 }
 0x87f   :  { %v1860_v32 = vpop.xlane.xlu0 %1859 }
 0x880   :  { %v1862_v33 = vmul.f32 0.03125, %v1860_v32 }
 0x882   :  { %v1864_v34 = vadd.f32 1e-05, %v1862_v33 }
 0x883   :  { %v1857_v35 = vpop.xlane.xlu0 %1856 }
 0x884   :  { %4701 = vrsqrt.f32 %v1864_v34  ;;  %v1861_v36 = vmul.f32 0.03125, %v1857_v35 }
 0x886   :  { %v1863_v37 = vadd.f32 1e-05, %v1861_v36 }
 0x888   :  { %4703 = vrsqrt.f32 %v1863_v37 }
 0x88b   :  { %v5787_v48 = vpop.permute.xlu0 %1892 }
 0x88e   :  { %v4702_v38 = vpop.eup %4701 }
 0x88f   :  { %v1868_v40 = vmul.f32 %v4702_v38, %v1852_v20 }
 0x891   :  { %v1876_v42 = vmul.f32 %v3982_v39, %v1868_v40  ;;  %v2140_v40 = vld [vmem:[#allocation2 + $0x8] sm:$0xff] }
 0x892   :  { %v4704_v41 = vpop.eup %4703 }
 0x893   :  { %v1867_v44 = vmul.f32 %v4704_v41, %v1851_v12  ;;  %v1884_v46 = vadd.f32 %v3983_v43, %v1876_v42  ;;  %v3984_v12 = vld [vmem:[#allocation8] ss:$0 sm:$0xff] }
 0x895   :  { %v1875_v45 = vmul.f32 %v3982_v39, %v1867_v44  ;;  %v5793_v51 = vmul.f32 %v5787_v48, %v1884_v46  ;;  %v2139_v44 = vld [vmem:[#allocation2] sm:$0xff] }
 0x897   :  { %v1883_v49 = vadd.f32 %v3983_v43, %v1875_v45 }
 0x899   :  { %v5790_v50 = vmul.f32 %v5785_v47, %v1883_v49 }
 0x89b   :  { %4275 = vmatprep.mubr.msk.f32.mxu1 %vm295_vm0, %v5790_v50 }
 0x89c   :  { %4276 = vmatmul.mubr.msk.f32.vlgmr.msra.gmra.mrb[20].mxu1 %vm295_vm0, %v5793_v51 }
 0x89d   :  { %4296 = vmatprep.mubr.msk.f32.mxu1 %vm5160_vm1, %v5157_v10  ;;  %4480 = vmatpush3.bf16.xpose.msk.msra.mxu1 %vm5803_vm5, %v4478_v60 }
 0x89e   :  { %4485 = vmatprep.subr.bf16.mxu1 %v5167_v31 }
 0x8ac   :  { %v5825_v0 = vpop.permute.xlu1 %4600 }
 0x8ad   :  { %v4603_v1 = vunpack.i.h.bf16 %v5825_v0  ;;  %v4602_v2 = vunpack.i.l.bf16 %v5825_v0 }
 0x8af   :  { %v4486_v13 = vpack.c.bf16 %v4603_v1, %v4602_v2 }
 0x8b0   :  { %v5829_v3 = vpop.permute.xlu1 %4605 }
 0x8b1   :  { %v4608_v7 = vunpack.i.h.bf16 %v5829_v3  ;;  %v4607_v4 = vunpack.i.l.bf16 %v5829_v3 }
 0x8b3   :  { %v4490_v16 = vpack.c.bf16 %v4608_v7, %v4607_v4 }
 0x8b4   :  { %v5833_v5 = vpop.permute.xlu1 %4610 }
 0x8b5   :  { %v4613_v6 = vunpack.i.h.bf16 %v5833_v5  ;;  %v4612_v8 = vunpack.i.l.bf16 %v5833_v5 }
 0x8b7   :  { %v4494_v24 = vpack.c.bf16 %v4613_v6, %v4612_v8 }
 0x8b8   :  { %v5837_v9 = vpop.permute.xlu1 %4615 }
 0x8b9   :  { %v4618_v11 = vunpack.i.h.bf16 %v5837_v9  ;;  %v4617_v20 = vunpack.i.l.bf16 %v5837_v9 }
 0x8bb   :  { %v4498_v22 = vpack.c.bf16 %v4618_v11, %v4617_v20 }
 0x96f   :  { %v4277_v21 = vpop.f32.mrb[20].mxu1 }
 0x970   :  { %v1986_v15 = vadd.f32 %v4277_v21, %v3984_v12  ;;  %v1980_v17 = vpop.f32.mrb[21].mxu1 }
 0x971   :  { %v1981_v14 = vadd.f32 %v3984_v12, %v1980_v17 }
 0x972   :  { %2101 = vrot.lane.b32.xlu1 %v1986_v15, %s5159_s27  ;;  %4304 = vmatmul.mubr.msk.f32.vlgmr.msra.gmra.mrb[20].mxu0 %vm395_vm2, %v1986_v15 }
 0x973   :  { %2103 = vrot.lane.b32.xlu0 %v1981_v14, %s5158_s6  ;;  %4297 = vmatmul.mubr.msk.f32.vlgmr.msra.gmra.mrb[22].mxu1 %vm395_vm2, %v1981_v14 }
 0x974   :  { %4488 = vmatpush3.bf16.xpose.msk.msra.mxu1 %vm5803_vm5, %v4486_v13  ;;  %4492 = vmatpush3.bf16.xpose.msk.msra.mxu0 %vm5803_vm5, %v4490_v16 }
 0x975   :  { %4317 = vmatprep.mubr.msk.f32.mxu0 %vm5160_vm1, %v5157_v10  ;;  %4497 = vmatprep.subr.bf16.mxu0 %v5167_v31 }
 0x976   :  { %2099 = vrot.lane.b32.xlu1 %v1981_v14, %s5159_s27  ;;  %4310 = vmatprep.mubr.msk.f32.mxu1 %vm5160_vm1, %v5157_v10 }
 0x977   :  { %2107 = vrot.lane.b32.xlu0 %v1981_v14, %s5161_s3  ;;  %4493 = vmatprep.subr.bf16.mxu1 %v5167_v31 }
 0x97a   :  { %4620 = vrot.lane.b32.xlu1 %v5807_v59, %s5161_s3 }
 0x97e   :  { %4625 = vrot.lane.b32.xlu1 %v5814_v62, %s5161_s3 }
 0x982   :  { %2105 = vrot.lane.b32.xlu1 %v1986_v15, %s5158_s6 }
 0x986   :  { %2109 = vrot.lane.b32.xlu1 %v1986_v15, %s5161_s3 }
 0x9e4   :  { %v2102_v23 = vpop.permute.xlu1 %2101 }
 0x9e5   :  { %4318 = vmatmul.mubr.msk.f32.vlgmr.msra.gmra.mrb[22].mxu0 %vm395_vm2, %v2102_v23  ;;  %v2104_v30 = vpop.permute.xlu0 %2103 }
 0x9e6   :  { %4500 = vmatpush3.bf16.xpose.msk.msra.mxu0 %vm5803_vm5, %v4498_v22  ;;  %4331 = vmatprep.mubr.msk.f32.mxu0 %vm5160_vm1, %v5157_v10 }
 0x9e7   :  { %4505 = vmatprep.subr.bf16.mxu0 %v5167_v31 }
 0x9e8   :  { %v2100_v25 = vpop.permute.xlu1 %2099 }
 0x9e9   :  { %4311 = vmatmul.mubr.msk.f32.vlgmr.msra.gmra.mrb[24].mxu1 %vm395_vm2, %v2100_v25  ;;  %v2108_v37 = vpop.permute.xlu0 %2107 }
 0x9ea   :  { %4496 = vmatpush3.bf16.xpose.msk.msra.mxu1 %vm5803_vm5, %v4494_v24  ;;  %4324 = vmatprep.mubr.msk.f32.mxu1 %vm5160_vm1, %v5157_v10 }
 0x9eb   :  { %4501 = vmatprep.subr.bf16.mxu1 %v5167_v31 }
 0x9ec   :  { %v5875_v26 = vpop.permute.xlu1 %4620 }
 0x9ed   :  { %v4623_v27 = vunpack.i.h.bf16 %v5875_v26  ;;  %v4622_v28 = vunpack.i.l.bf16 %v5875_v26 }
 0x9ef   :  { %v4502_v29 = vpack.c.bf16 %v4623_v27, %v4622_v28 }
 0x9f0   :  { %v5879_v32 = vpop.permute.xlu1 %4625 }
 0x9f1   :  { %v4628_v33 = vunpack.i.h.bf16 %v5879_v32  ;;  %v4627_v34 = vunpack.i.l.bf16 %v5879_v32  ;;  %4325 = vmatmul.mubr.msk.f32.vlgmr.msra.gmra.mrb[26].mxu1 %vm395_vm2, %v2104_v30 }
 0x9f2   :  { %4504 = vmatpush3.bf16.xpose.msk.msra.mxu1 %vm5803_vm5, %v4502_v29  ;;  %4338 = vmatprep.mubr.msk.f32.mxu1 %vm5160_vm1, %v5157_v10 }
 0x9f3   :  { %v4506_v35 = vpack.c.bf16 %v4628_v33, %v4627_v34  ;;  %4509 = vmatprep.subr.bf16.mxu1 %v5167_v31 }
 0x9f4   :  { %v2106_v36 = vpop.permute.xlu1 %2105 }
 0x9f5   :  { %4332 = vmatmul.mubr.msk.f32.vlgmr.msra.gmra.mrb[24].mxu0 %vm395_vm2, %v2106_v36 }
 0x9f6   :  { %4508 = vmatpush3.bf16.xpose.msk.msra.mxu0 %vm5803_vm5, %v4506_v35  ;;  %4345 = vmatprep.mubr.msk.f32.mxu0 %vm5160_vm1, %v5157_v10 }
 0x9f7   :  { %4515 = vmatprep.subr.bf16.mxu0 %v5167_v31 }
 0x9f8   :  { %v2110_v38 = vpop.permute.xlu1 %2109 }
 0x9f9   :  { %4339 = vmatmul.mubr.msk.f32.vlgmr.msra.gmra.mrb[28].mxu1 %vm395_vm2, %v2108_v37 }
 0x9fa   :  { %4352 = vmatprep.mubr.msk.f32.mxu1 %vm5160_vm1, %v5157_v10 }
 0x9fd   :  { %4346 = vmatmul.mubr.msk.f32.vlgmr.msra.gmra.mrb[26].mxu0 %vm395_vm2, %v2110_v38 }
 0x9fe   :  { %4366 = vmatprep.mubr.msk.f32.mxu0 %vm5160_vm1, %v5157_v10 }
 0xa45   :  { %v2289_v39 = vpop.f32.mrb[20].mxu0 }
 0xa46   :  { %v2750_v41 = vmul.f32 0.35355338, %v2289_v39  ;;  %v2213_v42 = vpop.f32.mrb[22].mxu1  ;;  %v4305_v43 = vpop.f32.mrb[21].mxu0 }
 0xa47   :  { %v2749_v45 = vmul.f32 0.35355338, %v2213_v42  ;;  %v4298_v46 = vpop.f32.mrb[23].mxu1 }
 0xa48   :  { %v2758_v49 = vadd.f32 %v2750_v41, %v2140_v40 }
 0xa49   :  { %v2757_v52 = vadd.f32 %v2749_v45, %v2139_v44 }
 0xa4a   :  { %v2768_v53 = vsel %vm1740_vm3, %v2758_v49, -inf }
 0xa4b   :  { %2769 = vmax.xlane.f32.xlu1 %v2768_v53  ;;  %v2765_v54 = vsel %vm1740_vm3, %v2757_v52, -inf }
 0xa4c   :  { %2766 = vmax.xlane.f32.xlu0 %v2765_v54 }
 0xab8   :  { %v2441_v55 = vpop.f32.mrb[22].mxu0 }
 0xab9   :  { %v4319_v56 = vpop.f32.mrb[23].mxu0  ;;  %v2752_v58 = vmul.f32 0.35355338, %v2441_v55 }
 0xabb   :  { %v2760_v63 = vadd.f32 %v2752_v58, %v2140_v40 }
 0xabc   :  { %v2365_v57 = vpop.f32.mrb[24].mxu1 }
 0xabd   :  { %v2751_v60 = vmul.f32 0.35355338, %v2365_v57  ;;  %v4312_v61 = vpop.f32.mrb[25].mxu1  ;;  %v2774_v4 = vsel %vm1740_vm3, %v2760_v63, -inf }
 0xabf   :  { %v2759_v18 = vadd.f32 %v2751_v60, %v2139_v44 }
 0xac1   :  { %v2771_v19 = vsel %vm1740_vm3, %v2759_v18, -inf }
 0xac2   :  { %2772 = vmax.xlane.f32.xlu0 %v2771_v19 }
 0xac4   :  { %v2517_v1 = vpop.f32.mrb[26].mxu1 }
 0xac5   :  { %v2753_v2 = vmul.f32 0.35355338, %v2517_v1  ;;  %v4326_v7 = vpop.f32.mrb[27].mxu1 }
 0xac6   :  { %2775 = vmax.xlane.f32.xlu0 %v2774_v4 }
 0xac7   :  { %v2761_v6 = vadd.f32 %v2753_v2, %v2139_v44 }
 0xac8   :  { %v2593_v8 = vpop.f32.mrb[24].mxu0 }
 0xac9   :  { %v2754_v11 = vmul.f32 0.35355338, %v2593_v8  ;;  %v4333_v20 = vpop.f32.mrb[25].mxu0  ;;  %v2777_v12 = vsel %vm1740_vm3, %v2761_v6, -inf }
 0xaca   :  { %2778 = vmax.xlane.f32.xlu1 %v2777_v12 }
 0xacb   :  { %v2762_v21 = vadd.f32 %v2754_v11, %v2140_v40 }
 0xacc   :  { %v2669_v15 = vpop.f32.mrb[28].mxu1 }
 0xacd   :  { %v2755_v17 = vmul.f32 0.35355338, %v2669_v15  ;;  %v4340_v13 = vpop.f32.mrb[29].mxu1  ;;  %v2780_v16 = vsel %vm1740_vm3, %v2762_v21, -inf }
 0xace   :  { %2781 = vmax.xlane.f32.xlu0 %v2780_v16 }
 0xacf   :  { %v2763_v14 = vadd.f32 %v2755_v17, %v2139_v44 }
 0xad0   :  { %v2745_v22 = vpop.f32.mrb[26].mxu0 }
 0xad1   :  { %v2756_v23 = vmul.f32 0.35355338, %v2745_v22  ;;  %v4347_v24 = vpop.f32.mrb[27].mxu0  ;;  %v2783_v25 = vsel %vm1740_vm3, %v2763_v14, -inf }
 0xad2   :  { %2784 = vmax.xlane.f32.xlu1 %v2783_v25 }
 0xad3   :  { %v2764_v27 = vadd.f32 %v2756_v23, %v2140_v40 }
 0xad5   :  { %v2786_v28 = vsel %vm1740_vm3, %v2764_v27, -inf }
 0xad6   :  { %2787 = vmax.xlane.f32.xlu0 %v2786_v28 }
 0xad8   :  { %v2770_v29 = vpop.xlane.xlu1 %2769 }
 0xad9   :  { %v2790_v30 = vsub.f32 %v2758_v49, %v2770_v29  ;;  %v2767_v33 = vpop.xlane.xlu0 %2766 }
 0xadb   :  { %v2799_v34 = vmul.f32 1.442695, %v2790_v30 }
 0xadd   :  { %4705 = vpow2.f32 %v2799_v34 }
 0xae3   :  { %4630 = vrot.lane.b32.xlu1 %v5807_v59, %s5162_s17  ;;  %v2789_v59 = vsub.f32 %v2757_v52, %v2767_v33 }
 0xae5   :  { %v2797_v35 = vmul.f32 1.442695, %v2789_v59 }
 0xae7   :  { %4640 = vrot.lane.b32.xlu1 %v5825_v0, %s5162_s17  ;;  %4707 = vpow2.f32 %v2797_v35  ;;  %v5921_v0 = vpop.eup %4705 }
 0xaeb   :  { %4645 = vrot.lane.b32.xlu1 %v5829_v3, %s5162_s17  ;;  %v2816_v3 = vsel %vm1740_vm3, %v5921_v0, 0.0 }
 0xaec   :  { %4635 = vrot.lane.b32.xlu0 %v5814_v62, %s5162_s17 }
 0xaef   :  { %4655 = vrot.lane.b32.xlu1 %v5837_v9, %s5162_s17 }
 0xaf0   :  { %4650 = vrot.lane.b32.xlu0 %v5833_v5, %s5162_s17 }
 0xaf1   :  { %v5925_v62 = vpop.eup %4707 }
 0xaf2   :  { %v2813_v9 = vsel %vm1740_vm3, %v5925_v62, 0.0 }
 0xb0f   :  { %2817 = vadd.xlane.f32.xlu0 %v2816_v3 }
 0xb13   :  { %2814 = vadd.xlane.f32.xlu1 %v2813_v9 }
 0xb4f   :  { %v2773_v5 = vpop.xlane.xlu0 %2772 }
 0xb50   :  { %v2791_v36 = vsub.f32 %v2759_v18, %v2773_v5 }
 0xb52   :  { %v2801_v37 = vmul.f32 1.442695, %v2791_v36 }
 0xb53   :  { %v2776_v38 = vpop.xlane.xlu0 %2775 }
 0xb54   :  { %4709 = vpow2.f32 %v2801_v37  ;;  %v2792_v39 = vsub.f32 %v2760_v63, %v2776_v38 }
 0xb56   :  { %v2803_v40 = vmul.f32 1.442695, %v2792_v39 }
 0xb57   :  { %v2779_v41 = vpop.xlane.xlu1 %2778 }
 0xb58   :  { %4711 = vpow2.f32 %v2803_v40  ;;  %v2793_v42 = vsub.f32 %v2761_v6, %v2779_v41 }
 0xb5a   :  { %v2805_v43 = vmul.f32 1.442695, %v2793_v42 }
 0xb5b   :  { %v2782_v44 = vpop.xlane.xlu0 %2781 }
 0xb5c   :  { %4713 = vpow2.f32 %v2805_v43  ;;  %v2794_v45 = vsub.f32 %v2762_v21, %v2782_v44 }
 0xb5e   :  { %v5929_v46 = vpop.eup %4709  ;;  %v2807_v49 = vmul.f32 1.442695, %v2794_v45 }
 0xb5f   :  { %v2785_v52 = vpop.xlane.xlu1 %2784  ;;  %v2819_v53 = vsel %vm1740_vm3, %v5929_v46, 0.0 }
 0xb60   :  { %4715 = vpow2.f32 %v2807_v49  ;;  %v2795_v54 = vsub.f32 %v2763_v14, %v2785_v52  ;;  %2820 = vadd.xlane.f32.xlu1 %v2819_v53 }
 0xb62   :  { %v5933_v55 = vpop.eup %4711  ;;  %v2809_v56 = vmul.f32 1.442695, %v2795_v54 }
 0xb63   :  { %v2788_v57 = vpop.xlane.xlu0 %2787  ;;  %v4631_v58 = vpop.permute.xlu1 %4630  ;;  %v2822_v60 = vsel %vm1740_vm3, %v5933_v55, 0.0 }
 0xb64   :  { %4717 = vpow2.f32 %v2809_v56  ;;  %v2796_v61 = vsub.f32 %v2764_v27, %v2788_v57  ;;  %v4633_v18 = vunpack.i.h.bf16 %v4631_v58  ;;  %v4632_v19 = vunpack.i.l.bf16 %v4631_v58  ;;  %2823 = vadd.xlane.f32.xlu0 %v2822_v60 }
 0xb66   :  { %v5937_v63 = vpop.eup %4713  ;;  %v2811_v1 = vmul.f32 1.442695, %v2796_v61  ;;  %v4510_v2 = vpack.c.bf16 %v4633_v18, %v4632_v19 }
 0xb67   :  { %v4641_v7 = vpop.permute.xlu1 %4640  ;;  %v2825_v4 = vsel %vm1740_vm3, %v5937_v63, 0.0  ;;  %v4636_v16 = vpop.permute.xlu0 %4635 }
 0xb68   :  { %4719 = vpow2.f32 %v2811_v1  ;;  %v4643_v6 = vunpack.i.h.bf16 %v4641_v7  ;;  %2826 = vadd.xlane.f32.xlu1 %v2825_v4  ;;  %4511 = vmatpush3.bf16.msra.mxu1 %v4510_v2  ;;  %v4642_v8 = vunpack.i.l.bf16 %v4641_v7  ;;  %v4638_v27 = vunpack.i.h.bf16 %v4636_v16 }
 0xb69   :  { %4512 = vmatprep.subr.bf16.mxu1 %v5167_v31  ;;  %v4637_v28 = vunpack.i.l.bf16 %v4636_v16 }
 0xb6a   :  { %v5942_v11 = vpop.eup %4715  ;;  %v4516_v20 = vpack.c.bf16 %v4643_v6, %v4642_v8 }
 0xb6b   :  { %v2828_v12 = vsel %vm1740_vm3, %v5942_v11, 0.0  ;;  %v4646_v14 = vpop.permute.xlu1 %4645  ;;  %v4651_v22 = vpop.permute.xlu0 %4650  ;;  %v4513_v34 = vpack.c.bf16 %v4638_v27, %v4637_v28 }
 0xb6c   :  { %2829 = vadd.xlane.f32.xlu0 %v2828_v12  ;;  %4517 = vmatpush3.bf16.msra.mxu0 %v4516_v20  ;;  %v4647_v59 = vunpack.i.l.bf16 %v4646_v14  ;;  %v4653_v5 = vunpack.i.h.bf16 %v4651_v22 }
 0xb6d   :  { %4521 = vmatprep.subr.bf16.mxu0 %v5167_v31 }
 0xb6e   :  { %v5946_v21 = vpop.eup %4717 }
 0xb6f   :  { %v2831_v15 = vsel %vm1740_vm3, %v5946_v21, 0.0  ;;  %v4656_v23 = vpop.permute.xlu1 %4655 }
 0xb70   :  { %2832 = vadd.xlane.f32.xlu1 %v2831_v15  ;;  %v4658_v40 = vunpack.i.h.bf16 %v4656_v23  ;;  %v4657_v41 = vunpack.i.l.bf16 %v4656_v23  ;;  %v3518_v15 = vld [vmem:[#allocation13 + $0x18] sm:$0xff] }
 0xb72   :  { %v5951_v17 = vpop.eup %4719  ;;  %v4525_v45 = vpack.c.bf16 %v4658_v40, %v4657_v41  ;;  %v4024_v40 = vld [vmem:[#allocation14] ss:$0 sm:$0xff] }
 0xb73   :  { %v2834_v13 = vsel %vm1740_vm3, %v5951_v17, 0.0 }
 0xb74   :  { %2835 = vadd.xlane.f32.xlu0 %v2834_v13 }
 0xb81   :  { %4665 = vrot.lane.b32.xlu1 %v5879_v32, %s5162_s17  ;;  %v4648_v32 = vunpack.i.h.bf16 %v4646_v14 }
 0xb83   :  { %v4519_v35 = vpack.c.bf16 %v4648_v32, %v4647_v59 }
 0xb8a   :  { %4660 = vrot.lane.b32.xlu0 %v5875_v26, %s5162_s17  ;;  %s5170_s17 = smov [#allocation28]  }
 0xb8b   :  { %s3928_s10 = sshll.u32 %s5170_s17, 4  ;;  %s3929_s10 = int_to_ptr.vmem [resolvable:$true] %s3928_s10 }
 0xb8c   :  { %p5102_p3 = scmp.lt.s32.totalorder %s3929_s10, %s3929_s10 }
 0xb9c   :  { %v2818_v24 = vpop.xlane.xlu0 %2817 }
 0xba0   :  { %v2815_v25 = vpop.xlane.xlu1 %2814 }
 0xba1   :  { %4721 = vrcp.f32 %v2815_v25 }
 0xba2   :  { %4723 = vrcp.f32 %v2818_v24 }
 0xbab   :  { %v4722_v29 = vpop.eup %4721 }
 0xbac   :  { %v5960_v30 = vmul.f32 %v4722_v29, %v5925_v62  ;;  %v4724_v33 = vpop.eup %4723 }
 0xbad   :  { %v5967_v26 = vmul.f32 %v4724_v33, %v5921_v0  ;;  %v4652_v0 = vunpack.i.l.bf16 %v4651_v22 }
 0xbae   :  { %4353 = vmatmul.mubr.msk.f32.vlgmr.msra.gmra.mrb[30].mxu1 %vm1740_vm3, %v5960_v30 }
 0xbaf   :  { %4514 = vmatpush3.bf16.msra.mxu1 %v4513_v34  ;;  %4359 = vmatprep.mubr.msk.f32.mxu1 %vm5160_vm1, %v5157_v10  ;;  %v4522_v39 = vpack.c.bf16 %v4653_v5, %v4652_v0 }
 0xbb0   :  { %4518 = vmatprep.subr.bf16.mxu1 %v5167_v31 }
 0xbb2   :  { %4360 = vmatmul.mubr.msk.f32.vlgmr.msra.gmra.mrb[32].mxu1 %vm1740_vm3, %v5967_v26 }
 0xbb3   :  { %4520 = vmatpush3.bf16.msra.mxu1 %v4519_v35  ;;  %4373 = vmatprep.mubr.msk.f32.mxu1 %vm5160_vm1, %v5157_v10 }
 0xbb4   :  { %4524 = vmatprep.subr.bf16.mxu1 %v5167_v31 }
 0xbed   :  { %v2821_v3 = vpop.xlane.xlu1 %2820 }
 0xbee   :  { %4725 = vrcp.f32 %v2821_v3 }
 0xbf1   :  { %v2824_v62 = vpop.xlane.xlu0 %2823 }
 0xbf2   :  { %4727 = vrcp.f32 %v2824_v62 }
 0xbf5   :  { %v2827_v9 = vpop.xlane.xlu1 %2826 }
 0xbf6   :  { %4729 = vrcp.f32 %v2827_v9 }
 0xbf8   :  { %v4726_v36 = vpop.eup %4725 }
 0xbf9   :  { %v5976_v37 = vmul.f32 %v4726_v36, %v5929_v46  ;;  %v2830_v38 = vpop.xlane.xlu0 %2829 }
 0xbfa   :  { %4731 = vrcp.f32 %v2830_v38 }
 0xbfb   :  { %4367 = vmatmul.mubr.msk.f32.vlgmr.msra.gmra.mrb[28].mxu0 %vm1740_vm3, %v5976_v37 }
 0xbfc   :  { %v4728_v42 = vpop.eup %4727  ;;  %4523 = vmatpush3.bf16.msra.mxu0 %v4522_v39  ;;  %4380 = vmatprep.mubr.msk.f32.mxu0 %vm5160_vm1, %v5157_v10 }
 0xbfd   :  { %v5983_v43 = vmul.f32 %v4728_v42, %v5933_v55  ;;  %v2833_v44 = vpop.xlane.xlu1 %2832  ;;  %4527 = vmatprep.subr.bf16.mxu0 %v5167_v31 }
 0xbfe   :  { %4733 = vrcp.f32 %v2833_v44 }
 0xbff   :  { %4374 = vmatmul.mubr.msk.f32.vlgmr.msra.gmra.mrb[34].mxu1 %vm1740_vm3, %v5983_v43 }
 0xc00   :  { %v4730_v46 = vpop.eup %4729  ;;  %4526 = vmatpush3.bf16.msra.mxu1 %v4525_v45  ;;  %4387 = vmatprep.mubr.msk.f32.mxu1 %vm5160_vm1, %v5157_v10 }
 0xc01   :  { %v5991_v49 = vmul.f32 %v4730_v46, %v5937_v63  ;;  %v2836_v52 = vpop.xlane.xlu0 %2835  ;;  %v4666_v53 = vpop.permute.xlu1 %4665  ;;  %4530 = vmatprep.subr.bf16.mxu1 %v5167_v31 }
 0xc02   :  { %4735 = vrcp.f32 %v2836_v52  ;;  %v4668_v54 = vunpack.i.h.bf16 %v4666_v53  ;;  %v4667_v55 = vunpack.i.l.bf16 %v4666_v53 }
 0xc03   :  { %4381 = vmatmul.mubr.msk.f32.vlgmr.msra.gmra.mrb[30].mxu0 %vm1740_vm3, %v5991_v49 }
 0xc04   :  { %v4732_v56 = vpop.eup %4731  ;;  %4394 = vmatprep.mubr.msk.f32.mxu0 %vm5160_vm1, %v5157_v10  ;;  %v4531_v60 = vpack.c.bf16 %v4668_v54, %v4667_v55 }
 0xc05   :  { %v5999_v57 = vmul.f32 %v4732_v56, %v5942_v11  ;;  %v4661_v58 = vpop.permute.xlu0 %4660  ;;  %v3515_v11 = vld [vmem:[#allocation13] sm:$0xff] }
 0xc06   :  { %v4663_v61 = vunpack.i.h.bf16 %v4661_v58  ;;  %v4662_v18 = vunpack.i.l.bf16 %v4661_v58 }
 0xc07   :  { %4388 = vmatmul.mubr.msk.f32.vlgmr.msra.gmra.mrb[36].mxu1 %vm1740_vm3, %v5999_v57 }
 0xc08   :  { %v4734_v31 = vpop.eup %4733  ;;  %v4528_v19 = vpack.c.bf16 %v4663_v61, %v4662_v18  ;;  %4532 = vmatpush3.bf16.msra.mxu1 %v4531_v60  ;;  %4401 = vmatprep.mubr.msk.f32.mxu1 %vm5160_vm1, %v5157_v10  ;;  %v3516_v10 = vld [vmem:[#allocation13 + $0x8] sm:$0xff] }
 0xc09   :  { %v6006_v63 = vmul.f32 %v4734_v31, %v5946_v21  ;;  %v4533_v12 = vpack.c.bf16 %v3516_v10, %v3515_v11  ;;  %v3517_v21 = vld [vmem:[#allocation13 + $0x10] sm:$0xff] }
 0xc0a   :  { %4529 = vmatpush3.bf16.msra.mxu0 %v4528_v19  ;;  %v4537_v13 = vpack.c.bf16 %v3518_v15, %v3517_v21  ;;  %v3777_v10 = vld [vmem:[%s6143_s21] sm:$0xff]  ;;  %v3780_v15 = vld [vmem:[%s6143_s21 + $0x18] sm:$0xff] }
 0xc0b   :  { %4534 = vmatprep.subr.bf16.mxu0 %v4533_v12 }
 0xc0c   :  { %v4736_v1 = vpop.eup %4735 }
 0xc0d   :  { %v6009_v2 = vmul.f32 %v4736_v1, %v5951_v17  ;;  %4395 = vmatmul.mubr.msk.f32.vlgmr.msra.gmra.mrb[32].mxu0 %vm1740_vm3, %v6006_v63 }
 0xc0e   :  { %4536 = vmatpush3.bf16.msra.mxu0 %v4533_v12  ;;  %v3779_v12 = vld [vmem:[%s6143_s21 + $0x10] sm:$0xff] }
 0xc0f   :  { %4402 = vmatmul.mubr.msk.f32.vlgmr.msra.gmra.mrb[38].mxu1 %vm1740_vm3, %v6009_v2  ;;  %4538 = vmatprep.subr.bf16.mxu0 %v4537_v13 }
 0xc12   :  { %4540 = vmatpush3.bf16.msra.mxu0 %v4537_v13  ;;  %v3781_v13 = vld [vmem:[%s6143_s21 + $0x20] sm:$0xff] }
 0xc81   :  { %v2928_v7 = vpop.f32.mrb[30].mxu1 }
 0xc82   :  { %v4354_v4 = vpop.f32.mrb[31].mxu1 }
 0xc85   :  { %v3007_v6 = vpop.f32.mrb[32].mxu1 }
 0xc86   :  { %v4361_v8 = vpop.f32.mrb[33].mxu1 }
 0xc87   :  { %v3686_v8 = vld [vmem:[%s6141_s19 + $0x18] sm:$0xff] }
 0xcce   :  { %v3086_v20 = vpop.f32.mrb[28].mxu0 }
 0xccf   :  { %3487 = vrot.lane.b32.xlu0 %v3086_v20, %s5148_s5  ;;  %v4368_v17 = vpop.f32.mrb[29].mxu0  ;;  %v3778_v20 = vld [vmem:[%s6143_s21 + $0x8] sm:$0xff] }
 0xcd0   :  { %v4549_v21 = vpack.c.bf16 %v3778_v20, %v3777_v10  ;;  %v4553_v17 = vpack.c.bf16 %v3780_v15, %v3779_v12 }
 0xcd2   :  { %v3165_v16 = vpop.f32.mrb[34].mxu1  ;;  %4550 = vmatprep.subr.bf16.mxu0 %v4549_v21 }
 0xcd3   :  { %3489 = vrot.lane.b32.xlu1 %v3165_v16, %s5148_s5  ;;  %v4375_v14 = vpop.f32.mrb[35].mxu1  ;;  %v3782_v16 = vld [vmem:[%s6143_s21 + $0x28] sm:$0xff] }
 0xcd4   :  { %v4557_v14 = vpack.c.bf16 %v3782_v16, %v3781_v13 }
 0xcd6   :  { %v3244_v22 = vpop.f32.mrb[30].mxu0 }
 0xcd7   :  { %3495 = vrot.lane.b32.xlu0 %v3244_v22, %s5164_s28  ;;  %v4382_v23 = vpop.f32.mrb[31].mxu0 }
 0xcda   :  { %v3323_v24 = vpop.f32.mrb[36].mxu1 }
 0xcdb   :  { %3497 = vrot.lane.b32.xlu1 %v3323_v24, %s5164_s28  ;;  %v4389_v25 = vpop.f32.mrb[37].mxu1 }
 0xce0   :  { %v3402_v27 = vpop.f32.mrb[32].mxu0 }
 0xce1   :  { %3503 = vrot.lane.b32.xlu0 %v3402_v27, %s5165_s14  ;;  %v4396_v28 = vpop.f32.mrb[33].mxu0 }
 0xce2   :  { %v3481_v29 = vpop.f32.mrb[38].mxu1 }
 0xce3   :  { %3505 = vrot.lane.b32.xlu1 %v3481_v29, %s5165_s14  ;;  %v4403_v33 = vpop.f32.mrb[39].mxu1 }
 0xce4   :  { %v4027_v33 = vld [vmem:[#allocation19] ss:$0 sm:$0xff] }
 0xd41   :  { %v3488_v34 = vpop.permute.xlu0 %3487 }
 0xd42   :  { %v3509_v3 = vsel %vm395_vm2, %v2928_v7, %v3488_v34  ;;  %v3684_v7 = vld [vmem:[%s6141_s19 + $0x8] sm:$0xff] }
 0xd45   :  { %v3490_v32 = vpop.permute.xlu1 %3489 }
 0xd46   :  { %v3510_v5 = vsel %vm395_vm2, %v3007_v6, %v3490_v32  ;;  %v3685_v6 = vld [vmem:[%s6141_s19 + $0x10] sm:$0xff]  ;;  %v4028_v32 = vld [vmem:[#allocation20] ss:$0 sm:$0xff] }
 0xd47   :  { %v4545_v11 = vpack.c.bf16 %v3686_v8, %v3685_v6 }
 0xd49   :  { %v3496_v59 = vpop.permute.xlu0 %3495 }
 0xd4a   :  { %v3511_v62 = vsel %vm1740_vm3, %v3509_v3, %v3496_v59 }
 0xd4d   :  { %v3498_v35 = vpop.permute.xlu1 %3497 }
 0xd4e   :  { %v3512_v36 = vsel %vm1740_vm3, %v3510_v5, %v3498_v35 }
 0xd53   :  { %v3504_v9 = vpop.permute.xlu0 %3503 }
 0xd54   :  { %v3513_v0 = vsel %vm1743_vm4, %v3511_v62, %v3504_v9 }
 0xd55   :  { %4412 = vmatprep.mubr.msk.f32.mxu0 %vm295_vm0, %v3513_v0  ;;  %v3506_v38 = vpop.permute.xlu1 %3505 }
 0xd56   :  { %v3514_v39 = vsel %vm1743_vm4, %v3512_v36, %v3506_v38  ;;  %v3783_v38 = vld [vmem:[%s6143_s21 + $0x30] sm:$0xff] }
 0xd57   :  { %4413 = vmatmul.mubr.msk.f32.vlgmr.msra.gmra.mrb[34].mxu0 %vm295_vm0, %v3514_v39  ;;  %v3784_v39 = vld [vmem:[%s6143_s21 + $0x38] sm:$0xff]  ;;  %s5168_s21 = smov 32  }
 0xd58   :  { %4552 = vmatpush3.bf16.msra.mxu0 %v4549_v21 }
 0xd59   :  { %4554 = vmatprep.subr.bf16.mxu0 %v4553_v17 }
 0xd5c   :  { %4556 = vmatpush3.bf16.msra.mxu0 %v4553_v17 }
 0xd5d   :  { %4558 = vmatprep.subr.bf16.mxu0 %v4557_v14 }
 0xd60   :  { %4560 = vmatpush3.bf16.msra.mxu0 %v4557_v14 }
 0xe2a   :  { %v4414_v41 = vpop.f32.mrb[34].mxu0 }
 0xe2b   :  { %v3604_v42 = vadd.f32 %v4414_v41, %v4024_v40  ;;  %v3598_v44 = vpop.f32.mrb[35].mxu0  ;;  %v4029_v41 = vld [vmem:[#allocation22] ss:$0 sm:$0xff] }
 0xe2c   :  { %v3599_v45 = vadd.f32 %v4024_v40, %v3598_v44  ;;  %v4561_v40 = vpack.c.bf16 %v3784_v39, %v3783_v38 }
 0xe2d   :  { %v3610_v46 = vadd.f32 %v3604_v42, %v5793_v51 }
 0xe2e   :  { %v3609_v52 = vadd.f32 %v3599_v45, %v5790_v50  ;;  %v3683_v50 = vld [vmem:[%s6141_s19] sm:$0xff]  ;;  %4562 = vmatprep.subr.bf16.mxu0 %v4561_v40 }
 0xe2f   :  { %v3614_v53 = vsel %vm295_vm0, %v3610_v46, 0.0  ;;  %v4541_v4 = vpack.c.bf16 %v3684_v7, %v3683_v50  ;;  %4564 = vmatpush3.bf16.msra.mxu0 %v4561_v40 }
 0xe30   :  { %3615 = vadd.xlane.f32.xlu1 %v3614_v53  ;;  %v3611_v54 = vsel %vm295_vm0, %v3609_v52, 0.0 }
 0xe31   :  { %3612 = vadd.xlane.f32.xlu0 %v3611_v54  ;;  %4542 = vmatprep.subr.bf16.mxu1 %v4541_v4  ;;  %v4032_v54 = vld [vmem:[#allocation23] ss:$0 sm:$0xff] }
 0xe32   :  { %4544 = vmatpush3.bf16.msra.mxu1 %v4541_v4 }
 0xe33   :  { %4546 = vmatprep.subr.bf16.mxu1 %v4545_v11 }
 0xe36   :  { %4548 = vmatpush3.bf16.msra.mxu1 %v4545_v11 }
 0xebd   :  { %v3616_v55 = vpop.xlane.xlu1 %3615 }
 0xebe   :  { %v3618_v56 = vmul.f32 0.03125, %v3616_v55  ;;  %v3613_v58 = vpop.xlane.xlu0 %3612 }
 0xebf   :  { %v3617_v60 = vmul.f32 0.03125, %v3613_v58 }
 0xec0   :  { %v3620_v61 = vsub.f32 %v3610_v46, %v3618_v56 }
 0xec1   :  { %v3619_v18 = vsub.f32 %v3609_v52, %v3617_v60 }
 0xec2   :  { %v3622_v1 = vmul.f32 %v3620_v61, %v3620_v61 }
 0xec3   :  { %v3621_v31 = vmul.f32 %v3619_v18, %v3619_v18 }
 0xec4   :  { %v3626_v51 = vsel %vm295_vm0, %v3622_v1, 0.0 }
 0xec5   :  { %v3623_v19 = vsel %vm295_vm0, %v3621_v31, 0.0 }
 0xec6   :  { %3624 = vadd.xlane.f32.xlu0 %v3623_v19 }
 0xeca   :  { %3627 = vadd.xlane.f32.xlu0 %v3626_v51 }
 0xf53   :  { %v3625_v22 = vpop.xlane.xlu0 %3624 }
 0xf54   :  { %v3629_v23 = vmul.f32 0.03125, %v3625_v22 }
 0xf56   :  { %v3631_v24 = vadd.f32 1e-05, %v3629_v23 }
 0xf57   :  { %v3628_v25 = vpop.xlane.xlu0 %3627 }
 0xf58   :  { %4737 = vrsqrt.f32 %v3631_v24  ;;  %v3630_v27 = vmul.f32 0.03125, %v3628_v25 }
 0xf5a   :  { %v3632_v28 = vadd.f32 1e-05, %v3630_v27 }
 0xf5c   :  { %4739 = vrsqrt.f32 %v3632_v28 }
 0xf62   :  { %v4738_v29 = vpop.eup %4737 }
 0xf63   :  { %v3635_v34 = vmul.f32 %v4738_v29, %v3619_v18 }
 0xf65   :  { %v3643_v59 = vmul.f32 %v4027_v33, %v3635_v34  ;;  %v4036_v34 = vld [vmem:[#allocation26] ss:$0 sm:$0xff] }
 0xf66   :  { %v4740_v35 = vpop.eup %4739 }
 0xf67   :  { %v3636_v3 = vmul.f32 %v4740_v35, %v3620_v61  ;;  %v3651_v62 = vadd.f32 %v4028_v32, %v3643_v59 }
 0xf69   :  { %v3644_v9 = vmul.f32 %v4027_v33, %v3636_v3  ;;  %v3653_v5 = vmul.f32 %v3651_v62, %v5785_v47 }
 0xf6b   :  { %v3652_v0 = vadd.f32 %v4028_v32, %v3644_v9  ;;  %4423 = vmatprep.mubr.msk.f32.mxu1 %vm295_vm0, %v3653_v5 }
 0xf6d   :  { %v3654_v36 = vmul.f32 %v3652_v0, %v5787_v48 }
 0xf6f   :  { %4424 = vmatmul.mubr.msk.f32.vlgmr.msra.gmra.mrb[40].mxu1 %vm295_vm0, %v3654_v36 }
0x1042   :  { %v4425_v42 = vpop.f32.mrb[40].mxu1 }
0x1043   :  { %v3772_v44 = vadd.f32 %v4425_v42, %v4029_v41  ;;  %v3766_v45 = vpop.f32.mrb[41].mxu1 }
0x1044   :  { %v3767_v46 = vadd.f32 %v4029_v41, %v3766_v45 }
0x1045   :  { %v3776_v53 = vmax.f32 %v3772_v44, 0.0 }
0x1046   :  { %v3775_v52 = vmax.f32 %v3767_v46, 0.0 }
0x1048   :  { %4442 = vmatprep.mubr.msk.f32.mxu0 %vm3680_vm6, %v3775_v52 }
0x1049   :  { %4443 = vmatmul.mubr.msk.f32.vlgmr.msra.gmra.mrb[36].mxu0 %vm3680_vm6, %v3776_v53 }
0x111c   :  { %v4444_v55 = vpop.f32.mrb[36].mxu0 }
0x111d   :  { %v3870_v56 = vadd.f32 %v4444_v55, %v4032_v54  ;;  %v3864_v58 = vpop.f32.mrb[37].mxu0 }
0x111e   :  { %v3865_v60 = vadd.f32 %v4032_v54, %v3864_v58 }
0x111f   :  { %v3876_v61 = vadd.f32 %v3870_v56, %v3654_v36 }
0x1120   :  { %v3875_v18 = vadd.f32 %v3865_v60, %v3653_v5 }
0x1121   :  { %v3880_v31 = vsel %vm295_vm0, %v3876_v61, 0.0 }
0x1122   :  { %3881 = vadd.xlane.f32.xlu0 %v3880_v31  ;;  %v3877_v19 = vsel %vm295_vm0, %v3875_v18, 0.0 }
0x1123   :  { %3878 = vadd.xlane.f32.xlu1 %v3877_v19 }
0x1134   :  { %3655 = vrot.lane.b32.xlu1 %v5976_v37, %s5164_s28 }
0x1138   :  { %3661 = vrot.lane.b32.xlu1 %v5991_v49, %s5168_s21 }
0x11af   :  { %v3882_v1 = vpop.xlane.xlu0 %3881 }
0x11b0   :  { %v3884_v51 = vmul.f32 0.03125, %v3882_v1  ;;  %v3879_v50 = vpop.xlane.xlu1 %3878 }
0x11b1   :  { %v3883_v7 = vmul.f32 0.03125, %v3879_v50 }
0x11b2   :  { %v3886_v4 = vsub.f32 %v3876_v61, %v3884_v51 }
0x11b3   :  { %v3885_v6 = vsub.f32 %v3875_v18, %v3883_v7 }
0x11b4   :  { %v3888_v8 = vmul.f32 %v3886_v4, %v3886_v4  ;;  %v3656_v37 = vpop.permute.xlu1 %3655 }
0x11b5   :  { %v3887_v11 = vmul.f32 %v3885_v6, %v3885_v6 }
0x11b6   :  { %v3892_v10 = vsel %vm295_vm0, %v3888_v8, 0.0 }
0x11b7   :  { %3893 = vadd.xlane.f32.xlu0 %v3892_v10  ;;  %v3889_v20 = vsel %vm295_vm0, %v3887_v11, 0.0 }
0x11b8   :  { %3890 = vadd.xlane.f32.xlu1 %v3889_v20  ;;  %v3662_v49 = vpop.permute.xlu1 %3661 }
0x11c9   :  { %3663 = vrot.lane.b32.xlu1 %v5999_v57, %s5168_s21  ;;  %v3673_v57 = vsel %vm1740_vm3, %v5960_v30, %v3656_v37  ;;  %v4035_v30 = vld [vmem:[#allocation25] ss:$0 sm:$0xff] }
0x11cd   :  { %3657 = vrot.lane.b32.xlu0 %v5983_v43, %s5164_s28  ;;  %3669 = vrot.lane.b32.xlu1 %v6009_v2, %s5169_s15 }
0x11d1   :  { %3667 = vrot.lane.b32.xlu0 %v6006_v63, %s5169_s15  ;;  %v3675_v63 = vsel %vm295_vm0, %v3673_v57, %v3662_v49 }
0x1244   :  { %v3894_v12 = vpop.xlane.xlu0 %3893 }
0x1245   :  { %v3896_v21 = vmul.f32 0.03125, %v3894_v12  ;;  %v3891_v15 = vpop.xlane.xlu1 %3890 }
0x1246   :  { %v3895_v17 = vmul.f32 0.03125, %v3891_v15 }
0x1247   :  { %v3898_v13 = vadd.f32 1e-05, %v3896_v21 }
0x1248   :  { %v3897_v16 = vadd.f32 1e-05, %v3895_v17  ;;  %v3658_v14 = vpop.permute.xlu0 %3657 }
0x1249   :  { %4741 = vrsqrt.f32 %v3898_v13  ;;  %v3664_v22 = vpop.permute.xlu1 %3663  ;;  %v3674_v43 = vsel %vm1740_vm3, %v5967_v26, %v3658_v14 }
0x124a   :  { %4743 = vrsqrt.f32 %v3897_v16  ;;  %v3676_v23 = vsel %vm295_vm0, %v3674_v43, %v3664_v22 }
0x124c   :  { %v3668_v2 = vpop.permute.xlu0 %3667 }
0x124d   :  { %v3678_v24 = vsel %vm3677_vm7, %v3675_v63, %v3668_v2  ;;  %v3670_v25 = vpop.permute.xlu1 %3669 }
0x124e   :  { %3681 = vst.msk [vmem:[%s6148_s26] sm:$0xff] %vm3680_vm6, %v3678_v24  ;;  %v3679_v27 = vsel %vm3677_vm7, %v3676_v23, %v3670_v25 }
0x124f   :  { %3682 = vst.msk [vmem:[%s6148_s26 + $0x8] sm:$0xff] %vm3680_vm6, %v3679_v27  ;;  %s5097_s26 = scalar_lea.vmem %s3929_s10, 256 }
0x1250   :  { %p5098_p2 = scmp.ne.s32.totalorder %s3929_s10, %s5097_s26  ;;  %p5103_p4 = scmp.lt.s32.totalorder %s5097_s26, %s5097_s26 }
0x1252   :  { %p5104_p5 = por %p5103_p4, %p5102_p3 }
0x1253   :  { %v4742_v26 = vpop.eup %4741 }
0x1254   :  { %v4744_v28 = vpop.eup %4743  ;;  %v3902_v29 = vmul.f32 %v4742_v26, %v3886_v4  ;;  %p5105_p6 = pnand %p5104_p5, %p5098_p2 }
0x1255   :  { %v3901_v33 = vmul.f32 %v4744_v28, %v3885_v6 }
0x1256   :  { %v3910_v32 = vmul.f32 %v4035_v30, %v3902_v29 }
0x1257   :  { %v3909_v59 = vmul.f32 %v4035_v30, %v3901_v33 }
0x1258   :  { %v3918_v35 = vadd.f32 %v4036_v34, %v3910_v32 }
0x1259   :  { %v3917_v3 = vadd.f32 %v4036_v34, %v3909_v59 }
0x125a   :  { %v3920_v62 = vmul.f32 %v3918_v35, %v5787_v48 }
0x125b   :  { %v3919_v9 = vmul.f32 %v3917_v3, %v5785_v47 }
0x125c   :  { %3922 = vst.msk [vmem:[#allocation28 + $0x8] sm:$0xff] %vm295_vm0, %v3920_v62 }
0x125d   :  { %3921 = vst.msk [vmem:[#allocation28] sm:$0xff] %vm295_vm0, %v3919_v9 }
0x125e   :  { %5108 = shalt.err (!%p5105_p6)
}
0x125f   :  { %s5109_s4 = scalar_lea.hbm %s6147_s25, 256 }
0x1260   :  { %p5110_p7 = scmp.ne.s32.totalorder %s6147_s25, %s5109_s4  ;;  %p5113_p8 = scmp.lt.u32.totalorder %s5109_s4, %s6147_s25 }
0x1262   :  { %p5115_p9 = pnand %p5113_p8, %p5110_p7 }
0x1264   :  { %5118 = shalt.err (!%p5115_p9)
}
0x1265   :  { %3934 = dma.vmem_to_hbm [thread:$0]  %s3929_s10, 256, %s6147_s25, [#allocation4], %s5147_s22, %s5147_s22, %s5148_s5  }
0x1266   :  { %5137 = dma.done.wait [#allocation4], 256  }
0x1267   :  { %5138 = vsyncadd [#allocation4], 4294967040 }
0x1268   :  { %3942 = vsyncpa [#allocation3], 1 }
0x1269   :  { %3943 = vsyncpa [#allocation6], 1 }
0x126a   :  { %3944 = vsyncpa [#allocation9], 1 }
0x126b   :  { %3945 = vsyncpa [#allocation12], 1 }
0x126c   :  { %3946 = vsyncpa [#allocation15], 1 }
0x126d   :  { %3947 = vsyncpa [#allocation18], 1 }
0x126e   :  { %3948 = vsyncpa [#allocation21], 1 }
0x126f   :  { %3949 = vsyncpa [#allocation24], 1 }
0x1270   :  { %3950 = vsyncpa [#allocation27], 1 }
0x1271   :  { %3951 = vsyncpa [#allocation4], 1 }

</bundles_post_ra>
